<compile_context>
chip_gen: v7x
topology: tpu7x:2x2x1
jax: 0.10.0
libtpu: 0.0.40
codegen_flags: <defaults>
</compile_context>

<pallas_src>
import re
import jax
import jax.numpy as jnp
from jax.experimental import pallas as pl
from jax.experimental.pallas import tpu as pltpu

# ---------------- synthetic model config (small, deterministic) -------------
VOCAB = 128
D_MODEL = 32
N_HEADS = 4
D_HEAD = D_MODEL // N_HEADS
D_FF = 64
SEQ = 8
N_LAYERS = 2
MAX_PROSODY = 8
LN_EPS = 1e-5

DP = 128                     # lane-padded feature dim (kernel-internal layout)

# ---- coalesced bf16 weight-slab row offsets (all multiples of 16 so bf16
# ---- (16,128) sublane tiles stay aligned for every static slice) -----------
TOK_OFF = 0                          # 128 rows: token embedding (VOCAB x DP)
POS_OFF = 128                        # 8 rows used / 16 reserved: positions
PROS_OFF = 144                       # 8 rows used / 16 reserved: prosody emb
LAYER_OFF = 160                      # per-layer blocks start here
WQKV_OFF = 0                         # 128 rows: fused [Wq|Wk|Wv] (lanes 0:96)
WO_OFF = 128                         # 32 rows : Wo  (lanes 0:32)
W1_OFF = 160                         # 128 rows: W1  (lanes 0:64)
W2_OFF = 288                         # 128 rows (64 real): W2 (lanes 0:32)
LAYER_ROWS = 416
TOTAL_ROWS = LAYER_OFF + N_LAYERS * LAYER_ROWS     # 992

# f32 bias/LN slab: 8 rows per layer -> (N_LAYERS*8, DP)
#   row 0: [bq*scale | bk | bv]   row 1: bo   row 2: ln1 gamma  row 3: ln1 beta
#   row 4: b1                     row 5: b2   row 6: ln2 gamma  row 7: ln2 beta
VEC_ROWS_PER_LAYER = 8


# ---------------- dependent host-side functions (string processing) ---------
def extract_prosody(text: str):
    """Very naive syllable count per word as prosody proxy."""
    return [len(re.findall('[aeiouy]+', w.lower())) for w in text.split()]


def tokenize(text: str):
    # TODO(synk): HuggingFace AutoTokenizer has no Pallas/JAX equivalent;
    # deterministic toy word-level tokenizer used as a stand-in.
    return [(sum(ord(c) for c in w) % (VOCAB - 1)) + 1 for w in text.split()]


# ---------------- Pallas kernel: fused embedding + all encoder layers -------
def text_encoder_kernel(ids_ref, pros_ref, kmask_ref, w_ref, v_ref, out_ref):
    f32 = jnp.float32

    # -- embedding lookup as one-hot MXU matmuls (no scalar-serialized loads) --
    ids = ids_ref[...]                                   # (SEQ, 1) int32
    pros = pros_ref[...]                                 # (SEQ, 1) int32
    tok_oh = jnp.where(
        jax.lax.broadcasted_iota(jnp.int32, (SEQ, VOCAB), 1) == ids, 1.0, 0.0)
    pro_oh = jnp.where(
        jax.lax.broadcasted_iota(jnp.int32, (SEQ, MAX_PROSODY), 1) == pros, 1.0, 0.0)

    x = (jnp.dot(tok_oh, w_ref[TOK_OFF:TOK_OFF + VOCAB, :],
                 preferred_element_type=f32)
         + jnp.dot(pro_oh, w_ref[PROS_OFF:PROS_OFF + MAX_PROSODY, :],
                   preferred_element_type=f32)
         + w_ref[POS_OFF:POS_OFF + SEQ, :].astype(f32))  # (SEQ, DP); lanes >= 32 are 0

    key_mask = kmask_ref[...]                            # (1, SEQ) additive key-pad mask

    # feature mask so LayerNorm statistics use only the 32 real features
    feat_mask = jnp.where(
        jax.lax.broadcasted_iota(jnp.int32, (1, DP), 1) < D_MODEL, 1.0, 0.0
    ).astype(f32)
    inv_d = f32(1.0 / D_MODEL)

    def layernorm(t, g, b):
        mu = jnp.sum(t, axis=-1, keepdims=True) * inv_d
        diff = (t - mu) * feat_mask
        var = jnp.sum(diff * diff, axis=-1, keepdims=True) * inv_d
        return diff * jax.lax.rsqrt(var + LN_EPS) * g + b

    def gelu(t):
        # TODO(synk): tanh-approx GELU; HF BART defaults to erf GELU (tiny drift).
        c = 0.7978845608028654                           # sqrt(2/pi)
        return 0.5 * t * (1.0 + jnp.tanh(c * (t + 0.044715 * t * t * t)))

    for l in range(N_LAYERS):                            # static unroll; x stays on-chip
        base = LAYER_OFF + l * LAYER_ROWS
        wqkv = w_ref[base + WQKV_OFF: base + WQKV_OFF + DP, :]        # (128,128) bf16
        wo = w_ref[base + WO_OFF: base + WO_OFF + D_MODEL, :]         # (32, 128)
        w1 = w_ref[base + W1_OFF: base + W1_OFF + DP, :]              # (128,128)
        w2 = w_ref[base + W2_OFF: base + W2_OFF + DP, :]              # (128,128), 64 real rows

        vec = v_ref[l * VEC_ROWS_PER_LAYER:(l + 1) * VEC_ROWS_PER_LAYER, :]  # (8,128) f32
        bqkv, bo = vec[0:1], vec[1:2]
        g1, be1 = vec[2:3], vec[3:4]
        b1, b2 = vec[4:5], vec[5:6]
        g2, be2 = vec[6:7], vec[7:8]

        # ----- fused QKV: one lane-dense matmul; 1/sqrt(Dh) pre-folded into Q cols
        qkv = jnp.dot(x, wqkv, preferred_element_type=f32) + bqkv     # (8, 128)

        # ----- per-head attention on static 8-lane slices of the QKV slab
        ctx_parts = []
        for h in range(N_HEADS):
            q = qkv[:, h * D_HEAD:(h + 1) * D_HEAD]
            k = qkv[:, D_MODEL + h * D_HEAD: D_MODEL + (h + 1) * D_HEAD]
            vv = qkv[:, 2 * D_MODEL + h * D_HEAD: 2 * D_MODEL + (h + 1) * D_HEAD]
            sc = jnp.dot(q, k.T, preferred_element_type=f32) + key_mask
            sc = sc - jnp.max(sc, axis=-1, keepdims=True)
            p = jnp.exp(sc)
            p = p * pl.reciprocal(jnp.sum(p, axis=-1, keepdims=True), approx=True)
            ctx_parts.append(jnp.dot(p, vv, preferred_element_type=f32))
        ctx = jnp.concatenate(ctx_parts, axis=-1)                     # (8, 32)

        # ----- fused output projection: single Wo matmul per layer
        attn = jnp.dot(ctx, wo, preferred_element_type=f32) + bo      # (8, 128)

        # ----- residual + post-LN (BART style)
        h1 = layernorm(x + attn, g1, be1)

        # ----- feed-forward (zero-padded lanes/rows keep the math exact)
        f = jnp.dot(h1, w1, preferred_element_type=f32) + b1
        f = gelu(f)
        f = jnp.dot(f, w2, preferred_element_type=f32) + b2

        x = layernorm(h1 + f, g2, be2)

    out_ref[...] = x                                     # single lane-dense (8,128) store


@jax.jit
def _encode(ids, pros, kmask, w_slab, v_slab):
    b = ids.shape[0]

    # advisory cost estimate only
    flops = b * (2 * SEQ * DP * (VOCAB + MAX_PROSODY)
                 + N_LAYERS * (2 * SEQ * DP * DP
                               + N_HEADS * 4 * SEQ * SEQ * D_HEAD
                               + 2 * SEQ * D_MODEL * DP
                               + 4 * SEQ * DP * DP))
    trans = b * N_LAYERS * (N_HEADS * SEQ * SEQ + SEQ * DP)
    nbytes = (int(w_slab.size) * 2 + int(v_slab.size) * 4
              + b * (SEQ * DP * 4 + SEQ * 2 * 4 + SEQ * 4))

    out_pad = pl.pallas_call(
        text_encoder_kernel,
        out_shape=jax.ShapeDtypeStruct((b, SEQ, DP), jnp.float32),
        grid_spec=pltpu.PrefetchScalarGridSpec(
            num_scalar_prefetch=0,
            grid=(b,),                                   # batch axis (B=1 for forward)
            in_specs=[
                pl.BlockSpec((None, SEQ, 1), lambda i: (i, 0, 0)),       # token ids
                pl.BlockSpec((None, SEQ, 1), lambda i: (i, 0, 0)),       # prosody ids
                pl.BlockSpec((None, 1, SEQ), lambda i: (i, 0, 0)),       # key-pad mask
                pl.BlockSpec((TOTAL_ROWS, DP), lambda i: (0, 0)),        # bf16 weight slab
                pl.BlockSpec((N_LAYERS * VEC_ROWS_PER_LAYER, DP),
                             lambda i: (0, 0)),                          # f32 bias/LN slab
            ],
            out_specs=pl.BlockSpec((None, SEQ, DP), lambda i: (i, 0, 0)),
        ),
        compiler_params=pltpu.CompilerParams(
            dimension_semantics=("parallel",)),          # v7x: 2 TCs split the batch
        cost_estimate=pl.CostEstimate(
            flops=flops, transcendentals=trans, bytes_accessed=nbytes),
    )(ids, pros, kmask, w_slab, v_slab)

    # drop lane padding: (B, SEQ, D_MODEL) last hidden state
    return out_pad[:, :, :D_MODEL]


# ---------------- deterministic parameter init (canonical layout) -----------
def init_params(key):
    scale = 0.02
    keys = jax.random.split(key, 3 + N_LAYERS)
    params = {
        "tok_emb": jax.random.normal(keys[0], (VOCAB, D_MODEL), jnp.float32) * scale,
        "pos_emb": jax.random.normal(keys[1], (SEQ, D_MODEL), jnp.float32) * scale,
        "pros_emb": jax.random.normal(keys[2], (MAX_PROSODY, D_MODEL), jnp.float32) * scale,
        "layers": [],
    }
    for l in range(N_LAYERS):
        lk = jax.random.split(keys[3 + l], 6)
        layer = (
            jax.random.normal(lk[0], (D_MODEL, D_MODEL), jnp.float32) * scale,  # wq
            jnp.zeros((1, D_MODEL), jnp.float32),                               # bq
            jax.random.normal(lk[1], (D_MODEL, D_MODEL), jnp.float32) * scale,  # wk
            jnp.zeros((1, D_MODEL), jnp.float32),                               # bk
            jax.random.normal(lk[2], (D_MODEL, D_MODEL), jnp.float32) * scale,  # wv
            jnp.zeros((1, D_MODEL), jnp.float32),                               # bv
            jax.random.normal(lk[3], (D_MODEL, D_MODEL), jnp.float32) * scale,  # wo
            jnp.zeros((1, D_MODEL), jnp.float32),                               # bo
            jnp.ones((1, D_MODEL), jnp.float32),                                # ln1 gamma
            jnp.zeros((1, D_MODEL), jnp.float32),                               # ln1 beta
            jax.random.normal(lk[4], (D_MODEL, D_FF), jnp.float32) * scale,     # w1
            jnp.zeros((1, D_FF), jnp.float32),                                  # b1
            jax.random.normal(lk[5], (D_FF, D_MODEL), jnp.float32) * scale,     # w2
            jnp.zeros((1, D_MODEL), jnp.float32),                               # b2
            jnp.ones((1, D_MODEL), jnp.float32),                                # ln2 gamma
            jnp.zeros((1, D_MODEL), jnp.float32),                               # ln2 beta
        )
        params["layers"].append(layer)
    return params


# ---------------- one-time repack into the fused-kernel layout ---------------
def pack_params(params):
    """Coalesce everything into two slabs:
       * w_slab (TOTAL_ROWS, 128) bf16: embeddings + per-layer [Wqkv | Wo | W1 | W2]
         with 1/sqrt(Dh) folded into the Q columns; all padding is zeros (the
         zero-in-padded-lanes invariant keeps LayerNorm stats exact).
       * v_slab (N_LAYERS*8, 128) f32: per-layer biases and LayerNorm params."""
    scale = 1.0 / (D_HEAD ** 0.5)
    w = jnp.zeros((TOTAL_ROWS, DP), jnp.float32)
    w = w.at[TOK_OFF:TOK_OFF + VOCAB, :D_MODEL].set(params["tok_emb"])
    w = w.at[POS_OFF:POS_OFF + SEQ, :D_MODEL].set(params["pos_emb"])
    w = w.at[PROS_OFF:PROS_OFF + MAX_PROSODY, :D_MODEL].set(params["pros_emb"])

    v = jnp.zeros((N_LAYERS * VEC_ROWS_PER_LAYER, DP), jnp.float32)

    for l, (wq, bq, wk, bk, wv, bv, wo, bo,
            g1, be1, w1, b1, w2, b2, g2, be2) in enumerate(params["layers"]):
        base = LAYER_OFF + l * LAYER_ROWS
        w = w.at[base + WQKV_OFF: base + WQKV_OFF + D_MODEL, 0:D_MODEL].set(wq * scale)
        w = w.at[base + WQKV_OFF: base + WQKV_OFF + D_MODEL, D_MODEL:2 * D_MODEL].set(wk)
        w = w.at[base + WQKV_OFF: base + WQKV_OFF + D_MODEL, 2 * D_MODEL:3 * D_MODEL].set(wv)
        w = w.at[base + WO_OFF: base + WO_OFF + D_MODEL, 0:D_MODEL].set(wo)
        w = w.at[base + W1_OFF: base + W1_OFF + D_MODEL, 0:D_FF].set(w1)
        w = w.at[base + W2_OFF: base + W2_OFF + D_FF, 0:D_MODEL].set(w2)

        r = l * VEC_ROWS_PER_LAYER
        v = v.at[r + 0, 0:D_MODEL].set(bq[0] * scale)
        v = v.at[r + 0, D_MODEL:2 * D_MODEL].set(bk[0])
        v = v.at[r + 0, 2 * D_MODEL:3 * D_MODEL].set(bv[0])
        v = v.at[r + 1, 0:D_MODEL].set(bo[0])
        v = v.at[r + 2, 0:D_MODEL].set(g1[0])
        v = v.at[r + 3, 0:D_MODEL].set(be1[0])
        v = v.at[r + 4, 0:D_FF].set(b1[0])
        v = v.at[r + 5, 0:D_MODEL].set(b2[0])
        v = v.at[r + 6, 0:D_MODEL].set(g2[0])
        v = v.at[r + 7, 0:D_MODEL].set(be2[0])

    return {"w": w.astype(jnp.bfloat16), "v": v}


# ---------------- TextEncoder.forward equivalent -----------------------------
def _prep_inputs(lyrics: str):
    ids = tokenize(lyrics)
    pros = extract_prosody(lyrics)
    n_valid = min(len(ids), SEQ)
    ids = (ids + [0] * SEQ)[:SEQ]
    pros = [min(max(int(p), 0), MAX_PROSODY - 1) for p in pros]
    pros = (pros + [0] * SEQ)[:SEQ]
    kmask = [0.0 if j < n_valid else -1e9 for j in range(SEQ)]
    return ids, pros, n_valid, kmask


def text_encoder_forward(lyrics: str, packed_params):
    ids, pros, _, kmask = _prep_inputs(lyrics)
    ids_a = jnp.asarray(ids, jnp.int32).reshape(1, SEQ, 1)
    pros_a = jnp.asarray(pros, jnp.int32).reshape(1, SEQ, 1)
    kmask_a = jnp.asarray(kmask, jnp.float32).reshape(1, 1, SEQ)
    return _encode(ids_a, pros_a, kmask_a, packed_params["w"], packed_params["v"])


# ---------------- pure-JAX reference (bf16-rounded weights) for self-check ---
def _ref_forward(ids, pros, n_valid, params):
    q16 = lambda a: a.astype(jnp.bfloat16).astype(jnp.float32)
    x = q16(params["tok_emb"])[ids] + q16(params["pos_emb"]) + q16(params["pros_emb"])[pros]
    mask = jnp.where(jnp.arange(SEQ)[None, :] < n_valid, 0.0, -1e9)
    scale = 1.0 / (D_HEAD ** 0.5)

    def ln(t, g, b):
        mu = t.mean(-1, keepdims=True)
        var = ((t - mu) ** 2).mean(-1, keepdims=True)
        return (t - mu) * jax.lax.rsqrt(var + LN_EPS) * g + b

    def gelu(t):
        c = 0.7978845608028654
        return 0.5 * t * (1.0 + jnp.tanh(c * (t + 0.044715 * t ** 3)))

    for (wq, bq, wk, bk, wv, bv, wo, bo, g1, be1, w1, b1, w2, b2, g2, be2) in params["layers"]:
        q = (x @ q16(wq)) * scale + bq * scale
        k = x @ q16(wk) + bk
        v = x @ q16(wv) + bv
        ctx = []
        for h in range(N_HEADS):
            sl = slice(h * D_HEAD, (h + 1) * D_HEAD)
            sc = q[:, sl] @ k[:, sl].T + mask
            p = jax.nn.softmax(sc, axis=-1)
            ctx.append(p @ v[:, sl])
        attn = jnp.concatenate(ctx, axis=-1) @ q16(wo) + bo
        h1 = ln(x + attn, g1, be1)
        f = gelu(h1 @ q16(w1) + b1)
        f = f @ q16(w2) + b2
        x = ln(h1 + f, g2, be2)
    return x


if __name__ == "__main__":
    key = jax.random.PRNGKey(0)
    params = init_params(key)
    packed = pack_params(params)

    lyrics = "hello darkness my old friend i have come"
    out = jax.block_until_ready(text_encoder_forward(lyrics, packed))

    assert out.shape == (1, SEQ, D_MODEL)
    assert bool(jnp.all(jnp.isfinite(out)))

    # numeric sanity check against a pure-JAX reference (same bf16 weight rounding)
    ids, pros, n_valid, _ = _prep_inputs(lyrics)
    ref = _ref_forward(jnp.asarray(ids, jnp.int32), jnp.asarray(pros, jnp.int32),
                       n_valid, params)
    max_err = float(jnp.max(jnp.abs(out[0] - ref)))
    assert max_err < 2e-2, f"kernel/reference mismatch: {max_err}"

    print("KERNEL_OK")
</pallas_src>

<mosaic_0001>
module attributes {stable_mosaic.version = 11 : i64} {
  func.func @text_encoder_kernel(%arg0: i32, %arg1: memref<1x8x1xi32, #tpu.memory_space<vmem>>, %arg2: memref<1x8x1xi32, #tpu.memory_space<vmem>>, %arg3: memref<1x1x8xf32, #tpu.memory_space<vmem>>, %arg4: memref<992x128xbf16, #tpu.memory_space<vmem>>, %arg5: memref<16x128xf32, #tpu.memory_space<vmem>>, %arg6: memref<1x8x128xf32, #tpu.memory_space<vmem>>) attributes {dimension_semantics = [#tpu.dimension_semantics<parallel>], iteration_bounds = array<i64: 1>, scalar_prefetch = 0 : i64, scratch_operands = 0 : i64, tpu.core_type = #tpu.core_type<tc>, window_params = [{transform_indices = @transform_0, window_bounds = array<i64: 1, 8, 1>}, {transform_indices = @transform_1, window_bounds = array<i64: 1, 8, 1>}, {transform_indices = @transform_2, window_bounds = array<i64: 1, 1, 8>}, {pipeline_mode = #tpu.pipeline_mode<synchronous>, transform_indices = @transform_3, window_bounds = array<i64: 992, 128>}, {pipeline_mode = #tpu.pipeline_mode<synchronous>, transform_indices = @transform_4, window_bounds = array<i64: 16, 128>}, {transform_indices = @transform_5, window_bounds = array<i64: 1, 8, 128>}]} {
    %c0 = arith.constant 0 : index
    %c0_0 = arith.constant 0 : index
    %c0_1 = arith.constant 0 : index
    %0 = vector.load %arg1[%c0, %c0_0, %c0_1] : memref<1x8x1xi32, #tpu.memory_space<vmem>>, vector<1x8x1xi32>
    %1 = vector.shape_cast %0 : vector<1x8x1xi32> to vector<8x1xi32>
    %c0_2 = arith.constant 0 : index
    %c0_3 = arith.constant 0 : index
    %c0_4 = arith.constant 0 : index
    %2 = vector.load %arg2[%c0_2, %c0_3, %c0_4] : memref<1x8x1xi32, #tpu.memory_space<vmem>>, vector<1x8x1xi32>
    %3 = vector.shape_cast %2 : vector<1x8x1xi32> to vector<8x1xi32>
    %4 = tpu.iota {dimensions = array<i32: 1>} : vector<8x128xi32>
    %5 = vector.broadcast %1 : vector<8x1xi32> to vector<8x128xi32>
    %6 = arith.cmpi eq, %4, %5 : vector<8x128xi32>
    %cst = arith.constant 1.000000e+00 : f32
    %cst_5 = arith.constant 0.000000e+00 : f32
    %7 = vector.broadcast %cst : f32 to vector<8x128xf32>
    %8 = vector.broadcast %cst_5 : f32 to vector<8x128xf32>
    %9 = arith.select %6, %7, %8 : vector<8x128xi1>, vector<8x128xf32>
    %10 = tpu.iota {dimensions = array<i32: 1>} : vector<8x8xi32>
    %11 = vector.broadcast %3 : vector<8x1xi32> to vector<8x8xi32>
    %12 = arith.cmpi eq, %10, %11 : vector<8x8xi32>
    %cst_6 = arith.constant 1.000000e+00 : f32
    %cst_7 = arith.constant 0.000000e+00 : f32
    %13 = vector.broadcast %cst_6 : f32 to vector<8x8xf32>
    %14 = vector.broadcast %cst_7 : f32 to vector<8x8xf32>
    %15 = arith.select %12, %13, %14 : vector<8x8xi1>, vector<8x8xf32>
    %c0_8 = arith.constant 0 : index
    %c0_9 = arith.constant 0 : index
    %16 = vector.load %arg4[%c0_8, %c0_9] : memref<992x128xbf16, #tpu.memory_space<vmem>>, vector<128x128xbf16>
    %cst_10 = arith.constant dense<0.000000e+00> : vector<8x128xf32>
    %17 = tpu.matmul %9, %16, %cst_10 {dimension_numbers = #tpu.dot_dimension_numbers<[1], [0], [0], [1], [0, 0, 1, 1], [], []>} : vector<8x128xf32>, vector<128x128xbf16>, vector<8x128xf32> -> vector<8x128xf32>
    %c144 = arith.constant 144 : index
    %c0_11 = arith.constant 0 : index
    %18 = vector.load %arg4[%c144, %c0_11] : memref<992x128xbf16, #tpu.memory_space<vmem>>, vector<8x128xbf16>
    %cst_12 = arith.constant dense<0.000000e+00> : vector<8x128xf32>
    %19 = tpu.matmul %15, %18, %cst_12 {dimension_numbers = #tpu.dot_dimension_numbers<[1], [0], [0], [1], [0, 0, 1, 1], [], []>} : vector<8x8xf32>, vector<8x128xbf16>, vector<8x128xf32> -> vector<8x128xf32>
    %20 = arith.addf %17, %19 : vector<8x128xf32>
    %c128 = arith.constant 128 : index
    %c0_13 = arith.constant 0 : index
    %21 = vector.load %arg4[%c128, %c0_13] : memref<992x128xbf16, #tpu.memory_space<vmem>>, vector<8x128xbf16>
    %22 = arith.extf %21 : vector<8x128xbf16> to vector<8x128xf32>
    %23 = arith.addf %20, %22 : vector<8x128xf32>
    %c0_14 = arith.constant 0 : index
    %c0_15 = arith.constant 0 : index
    %c0_16 = arith.constant 0 : index
    %24 = vector.load %arg3[%c0_14, %c0_15, %c0_16] : memref<1x1x8xf32, #tpu.memory_space<vmem>>, vector<1x1x8xf32>
    %25 = vector.shape_cast %24 : vector<1x1x8xf32> to vector<1x8xf32>
    %26 = tpu.iota {dimensions = array<i32: 1>} : vector<1x128xi32>
    %c32_i32 = arith.constant 32 : i32
    %27 = vector.broadcast %c32_i32 : i32 to vector<1x128xi32>
    %28 = arith.cmpi slt, %26, %27 : vector<1x128xi32>
    %cst_17 = arith.constant 1.000000e+00 : f32
    %cst_18 = arith.constant 0.000000e+00 : f32
    %29 = vector.broadcast %cst_17 : f32 to vector<1x128xf32>
    %30 = vector.broadcast %cst_18 : f32 to vector<1x128xf32>
    %31 = arith.select %28, %29, %30 : vector<1x128xi1>, vector<1x128xf32>
    %c160 = arith.constant 160 : index
    %c0_19 = arith.constant 0 : index
    %32 = vector.load %arg4[%c160, %c0_19] : memref<992x128xbf16, #tpu.memory_space<vmem>>, vector<128x128xbf16>
    %c288 = arith.constant 288 : index
    %c0_20 = arith.constant 0 : index
    %33 = vector.load %arg4[%c288, %c0_20] : memref<992x128xbf16, #tpu.memory_space<vmem>>, vector<32x128xbf16>
    %c320 = arith.constant 320 : index
    %c0_21 = arith.constant 0 : index
    %34 = vector.load %arg4[%c320, %c0_21] : memref<992x128xbf16, #tpu.memory_space<vmem>>, vector<128x128xbf16>
    %c448 = arith.constant 448 : index
    %c0_22 = arith.constant 0 : index
    %35 = vector.load %arg4[%c448, %c0_22] : memref<992x128xbf16, #tpu.memory_space<vmem>>, vector<128x128xbf16>
    %c0_23 = arith.constant 0 : index
    %c0_24 = arith.constant 0 : index
    %36 = vector.load %arg5[%c0_23, %c0_24] : memref<16x128xf32, #tpu.memory_space<vmem>>, vector<8x128xf32>
    %37 = vector.extract_strided_slice %36 {offsets = [0, 0], sizes = [1, 128], strides = [1, 1]} : vector<8x128xf32> to vector<1x128xf32>
    %38 = vector.extract_strided_slice %36 {offsets = [1, 0], sizes = [1, 128], strides = [1, 1]} : vector<8x128xf32> to vector<1x128xf32>
    %39 = vector.extract_strided_slice %36 {offsets = [2, 0], sizes = [1, 128], strides = [1, 1]} : vector<8x128xf32> to vector<1x128xf32>
    %40 = vector.extract_strided_slice %36 {offsets = [3, 0], sizes = [1, 128], strides = [1, 1]} : vector<8x128xf32> to vector<1x128xf32>
    %41 = vector.extract_strided_slice %36 {offsets = [4, 0], sizes = [1, 128], strides = [1, 1]} : vector<8x128xf32> to vector<1x128xf32>
    %42 = vector.extract_strided_slice %36 {offsets = [5, 0], sizes = [1, 128], strides = [1, 1]} : vector<8x128xf32> to vector<1x128xf32>
    %43 = vector.extract_strided_slice %36 {offsets = [6, 0], sizes = [1, 128], strides = [1, 1]} : vector<8x128xf32> to vector<1x128xf32>
    %44 = vector.extract_strided_slice %36 {offsets = [7, 0], sizes = [1, 128], strides = [1, 1]} : vector<8x128xf32> to vector<1x128xf32>
    %cst_25 = arith.constant dense<0.000000e+00> : vector<8x128xf32>
    %45 = tpu.matmul %23, %32, %cst_25 {dimension_numbers = #tpu.dot_dimension_numbers<[1], [0], [0], [1], [0, 0, 1, 1], [], []>} : vector<8x128xf32>, vector<128x128xbf16>, vector<8x128xf32> -> vector<8x128xf32>
    %46 = vector.broadcast %37 : vector<1x128xf32> to vector<8x128xf32>
    %47 = arith.addf %45, %46 : vector<8x128xf32>
    %48 = vector.extract_strided_slice %47 {offsets = [0, 0], sizes = [8, 8], strides = [1, 1]} : vector<8x128xf32> to vector<8x8xf32>
    %49 = vector.extract_strided_slice %47 {offsets = [0, 32], sizes = [8, 8], strides = [1, 1]} : vector<8x128xf32> to vector<8x8xf32>
    %50 = vector.extract_strided_slice %47 {offsets = [0, 64], sizes = [8, 8], strides = [1, 1]} : vector<8x128xf32> to vector<8x8xf32>
    %51 = tpu.transpose %49, [1, 0] : vector<8x8xf32> -> vector<8x8xf32>
    %cst_26 = arith.constant dense<0.000000e+00> : vector<8x8xf32>
    %52 = tpu.matmul %48, %51, %cst_26 {dimension_numbers = #tpu.dot_dimension_numbers<[1], [0], [0], [1], [0, 0, 1, 1], [], []>} : vector<8x8xf32>, vector<8x8xf32>, vector<8x8xf32> -> vector<8x8xf32>
    %53 = vector.broadcast %25 : vector<1x8xf32> to vector<8x8xf32>
    %54 = arith.addf %52, %53 : vector<8x8xf32>
    %cst_27 = arith.constant dense<0xFF800000> : vector<8xf32>
    %55 = vector.multi_reduction <maximumf>, %54, %cst_27 [1] : vector<8x8xf32> to vector<8xf32>
    %56 = vector.shape_cast %55 : vector<8xf32> to vector<8x1xf32>
    %57 = vector.broadcast %56 : vector<8x1xf32> to vector<8x8xf32>
    %58 = arith.subf %54, %57 : vector<8x8xf32>
    %59 = math.exp %58 : vector<8x8xf32>
    %cst_28 = arith.constant dense<0.000000e+00> : vector<8xf32>
    %60 = vector.multi_reduction <add>, %59, %cst_28 [1] : vector<8x8xf32> to vector<8xf32>
    %61 = vector.shape_cast %60 : vector<8xf32> to vector<8x1xf32>
    %62 = tpu.reciprocal %61 {approx = true} : vector<8x1xf32> -> vector<8x1xf32>
    %63 = vector.broadcast %62 : vector<8x1xf32> to vector<8x8xf32>
    %64 = arith.mulf %59, %63 : vector<8x8xf32>
    %cst_29 = arith.constant dense<0.000000e+00> : vector<8x8xf32>
    %65 = tpu.matmul %64, %50, %cst_29 {dimension_numbers = #tpu.dot_dimension_numbers<[1], [0], [0], [1], [0, 0, 1, 1], [], []>} : vector<8x8xf32>, vector<8x8xf32>, vector<8x8xf32> -> vector<8x8xf32>
    %66 = vector.extract_strided_slice %47 {offsets = [0, 8], sizes = [8, 8], strides = [1, 1]} : vector<8x128xf32> to vector<8x8xf32>
    %67 = vector.extract_strided_slice %47 {offsets = [0, 40], sizes = [8, 8], strides = [1, 1]} : vector<8x128xf32> to vector<8x8xf32>
    %68 = vector.extract_strided_slice %47 {offsets = [0, 72], sizes = [8, 8], strides = [1, 1]} : vector<8x128xf32> to vector<8x8xf32>
    %69 = tpu.transpose %67, [1, 0] : vector<8x8xf32> -> vector<8x8xf32>
    %cst_30 = arith.constant dense<0.000000e+00> : vector<8x8xf32>
    %70 = tpu.matmul %66, %69, %cst_30 {dimension_numbers = #tpu.dot_dimension_numbers<[1], [0], [0], [1], [0, 0, 1, 1], [], []>} : vector<8x8xf32>, vector<8x8xf32>, vector<8x8xf32> -> vector<8x8xf32>
    %71 = vector.broadcast %25 : vector<1x8xf32> to vector<8x8xf32>
    %72 = arith.addf %70, %71 : vector<8x8xf32>
    %cst_31 = arith.constant dense<0xFF800000> : vector<8xf32>
    %73 = vector.multi_reduction <maximumf>, %72, %cst_31 [1] : vector<8x8xf32> to vector<8xf32>
    %74 = vector.shape_cast %73 : vector<8xf32> to vector<8x1xf32>
    %75 = vector.broadcast %74 : vector<8x1xf32> to vector<8x8xf32>
    %76 = arith.subf %72, %75 : vector<8x8xf32>
    %77 = math.exp %76 : vector<8x8xf32>
    %cst_32 = arith.constant dense<0.000000e+00> : vector<8xf32>
    %78 = vector.multi_reduction <add>, %77, %cst_32 [1] : vector<8x8xf32> to vector<8xf32>
    %79 = vector.shape_cast %78 : vector<8xf32> to vector<8x1xf32>
    %80 = tpu.reciprocal %79 {approx = true} : vector<8x1xf32> -> vector<8x1xf32>
    %81 = vector.broadcast %80 : vector<8x1xf32> to vector<8x8xf32>
    %82 = arith.mulf %77, %81 : vector<8x8xf32>
    %cst_33 = arith.constant dense<0.000000e+00> : vector<8x8xf32>
    %83 = tpu.matmul %82, %68, %cst_33 {dimension_numbers = #tpu.dot_dimension_numbers<[1], [0], [0], [1], [0, 0, 1, 1], [], []>} : vector<8x8xf32>, vector<8x8xf32>, vector<8x8xf32> -> vector<8x8xf32>
    %84 = vector.extract_strided_slice %47 {offsets = [0, 16], sizes = [8, 8], strides = [1, 1]} : vector<8x128xf32> to vector<8x8xf32>
    %85 = vector.extract_strided_slice %47 {offsets = [0, 48], sizes = [8, 8], strides = [1, 1]} : vector<8x128xf32> to vector<8x8xf32>
    %86 = vector.extract_strided_slice %47 {offsets = [0, 80], sizes = [8, 8], strides = [1, 1]} : vector<8x128xf32> to vector<8x8xf32>
    %87 = tpu.transpose %85, [1, 0] : vector<8x8xf32> -> vector<8x8xf32>
    %cst_34 = arith.constant dense<0.000000e+00> : vector<8x8xf32>
    %88 = tpu.matmul %84, %87, %cst_34 {dimension_numbers = #tpu.dot_dimension_numbers<[1], [0], [0], [1], [0, 0, 1, 1], [], []>} : vector<8x8xf32>, vector<8x8xf32>, vector<8x8xf32> -> vector<8x8xf32>
    %89 = vector.broadcast %25 : vector<1x8xf32> to vector<8x8xf32>
    %90 = arith.addf %88, %89 : vector<8x8xf32>
    %cst_35 = arith.constant dense<0xFF800000> : vector<8xf32>
    %91 = vector.multi_reduction <maximumf>, %90, %cst_35 [1] : vector<8x8xf32> to vector<8xf32>
    %92 = vector.shape_cast %91 : vector<8xf32> to vector<8x1xf32>
    %93 = vector.broadcast %92 : vector<8x1xf32> to vector<8x8xf32>
    %94 = arith.subf %90, %93 : vector<8x8xf32>
    %95 = math.exp %94 : vector<8x8xf32>
    %cst_36 = arith.constant dense<0.000000e+00> : vector<8xf32>
    %96 = vector.multi_reduction <add>, %95, %cst_36 [1] : vector<8x8xf32> to vector<8xf32>
    %97 = vector.shape_cast %96 : vector<8xf32> to vector<8x1xf32>
    %98 = tpu.reciprocal %97 {approx = true} : vector<8x1xf32> -> vector<8x1xf32>
    %99 = vector.broadcast %98 : vector<8x1xf32> to vector<8x8xf32>
    %100 = arith.mulf %95, %99 : vector<8x8xf32>
    %cst_37 = arith.constant dense<0.000000e+00> : vector<8x8xf32>
    %101 = tpu.matmul %100, %86, %cst_37 {dimension_numbers = #tpu.dot_dimension_numbers<[1], [0], [0], [1], [0, 0, 1, 1], [], []>} : vector<8x8xf32>, vector<8x8xf32>, vector<8x8xf32> -> vector<8x8xf32>
    %102 = vector.extract_strided_slice %47 {offsets = [0, 24], sizes = [8, 8], strides = [1, 1]} : vector<8x128xf32> to vector<8x8xf32>
    %103 = vector.extract_strided_slice %47 {offsets = [0, 56], sizes = [8, 8], strides = [1, 1]} : vector<8x128xf32> to vector<8x8xf32>
    %104 = vector.extract_strided_slice %47 {offsets = [0, 88], sizes = [8, 8], strides = [1, 1]} : vector<8x128xf32> to vector<8x8xf32>
    %105 = tpu.transpose %103, [1, 0] : vector<8x8xf32> -> vector<8x8xf32>
    %cst_38 = arith.constant dense<0.000000e+00> : vector<8x8xf32>
    %106 = tpu.matmul %102, %105, %cst_38 {dimension_numbers = #tpu.dot_dimension_numbers<[1], [0], [0], [1], [0, 0, 1, 1], [], []>} : vector<8x8xf32>, vector<8x8xf32>, vector<8x8xf32> -> vector<8x8xf32>
    %107 = vector.broadcast %25 : vector<1x8xf32> to vector<8x8xf32>
    %108 = arith.addf %106, %107 : vector<8x8xf32>
    %cst_39 = arith.constant dense<0xFF800000> : vector<8xf32>
    %109 = vector.multi_reduction <maximumf>, %108, %cst_39 [1] : vector<8x8xf32> to vector<8xf32>
    %110 = vector.shape_cast %109 : vector<8xf32> to vector<8x1xf32>
    %111 = vector.broadcast %110 : vector<8x1xf32> to vector<8x8xf32>
    %112 = arith.subf %108, %111 : vector<8x8xf32>
    %113 = math.exp %112 : vector<8x8xf32>
    %cst_40 = arith.constant dense<0.000000e+00> : vector<8xf32>
    %114 = vector.multi_reduction <add>, %113, %cst_40 [1] : vector<8x8xf32> to vector<8xf32>
    %115 = vector.shape_cast %114 : vector<8xf32> to vector<8x1xf32>
    %116 = tpu.reciprocal %115 {approx = true} : vector<8x1xf32> -> vector<8x1xf32>
    %117 = vector.broadcast %116 : vector<8x1xf32> to vector<8x8xf32>
    %118 = arith.mulf %113, %117 : vector<8x8xf32>
    %cst_41 = arith.constant dense<0.000000e+00> : vector<8x8xf32>
    %119 = tpu.matmul %118, %104, %cst_41 {dimension_numbers = #tpu.dot_dimension_numbers<[1], [0], [0], [1], [0, 0, 1, 1], [], []>} : vector<8x8xf32>, vector<8x8xf32>, vector<8x8xf32> -> vector<8x8xf32>
    %120 = tpu.concatenate %65, %83, %101, %119 in 1 : vector<8x8xf32>, vector<8x8xf32>, vector<8x8xf32>, vector<8x8xf32> -> vector<8x32xf32>
    %cst_42 = arith.constant dense<0.000000e+00> : vector<8x128xf32>
    %121 = tpu.matmul %120, %33, %cst_42 {dimension_numbers = #tpu.dot_dimension_numbers<[1], [0], [0], [1], [0, 0, 1, 1], [], []>} : vector<8x32xf32>, vector<32x128xbf16>, vector<8x128xf32> -> vector<8x128xf32>
    %122 = vector.broadcast %38 : vector<1x128xf32> to vector<8x128xf32>
    %123 = arith.addf %121, %122 : vector<8x128xf32>
    %124 = arith.addf %23, %123 : vector<8x128xf32>
    %cst_43 = arith.constant dense<0.000000e+00> : vector<8xf32>
    %125 = vector.multi_reduction <add>, %124, %cst_43 [1] : vector<8x128xf32> to vector<8xf32>
    %126 = vector.shape_cast %125 : vector<8xf32> to vector<8x1xf32>
    %cst_44 = arith.constant 3.125000e-02 : f32
    %127 = vector.broadcast %cst_44 : f32 to vector<8x1xf32>
    %128 = arith.mulf %126, %127 : vector<8x1xf32>
    %129 = vector.broadcast %128 : vector<8x1xf32> to vector<8x128xf32>
    %130 = arith.subf %124, %129 : vector<8x128xf32>
    %131 = vector.broadcast %31 : vector<1x128xf32> to vector<8x128xf32>
    %132 = arith.mulf %130, %131 : vector<8x128xf32>
    %133 = arith.mulf %132, %132 : vector<8x128xf32>
    %cst_45 = arith.constant dense<0.000000e+00> : vector<8xf32>
    %134 = vector.multi_reduction <add>, %133, %cst_45 [1] : vector<8x128xf32> to vector<8xf32>
    %135 = vector.shape_cast %134 : vector<8xf32> to vector<8x1xf32>
    %cst_46 = arith.constant 3.125000e-02 : f32
    %136 = vector.broadcast %cst_46 : f32 to vector<8x1xf32>
    %137 = arith.mulf %135, %136 : vector<8x1xf32>
    %cst_47 = arith.constant 9.99999974E-6 : f32
    %138 = vector.broadcast %cst_47 : f32 to vector<8x1xf32>
    %139 = arith.addf %137, %138 : vector<8x1xf32>
    %140 = math.rsqrt %139 : vector<8x1xf32>
    %141 = vector.broadcast %140 : vector<8x1xf32> to vector<8x128xf32>
    %142 = arith.mulf %132, %141 : vector<8x128xf32>
    %143 = vector.broadcast %39 : vector<1x128xf32> to vector<8x128xf32>
    %144 = arith.mulf %142, %143 : vector<8x128xf32>
    %145 = vector.broadcast %40 : vector<1x128xf32> to vector<8x128xf32>
    %146 = arith.addf %144, %145 : vector<8x128xf32>
    %cst_48 = arith.constant dense<0.000000e+00> : vector<8x128xf32>
    %147 = tpu.matmul %146, %34, %cst_48 {dimension_numbers = #tpu.dot_dimension_numbers<[1], [0], [0], [1], [0, 0, 1, 1], [], []>} : vector<8x128xf32>, vector<128x128xbf16>, vector<8x128xf32> -> vector<8x128xf32>
    %148 = vector.broadcast %41 : vector<1x128xf32> to vector<8x128xf32>
    %149 = arith.addf %147, %148 : vector<8x128xf32>
    %cst_49 = arith.constant 5.000000e-01 : f32
    %150 = vector.broadcast %cst_49 : f32 to vector<8x128xf32>
    %151 = arith.mulf %150, %149 : vector<8x128xf32>
    %cst_50 = arith.constant 4.471500e-02 : f32
    %152 = vector.broadcast %cst_50 : f32 to vector<8x128xf32>
    %153 = arith.mulf %152, %149 : vector<8x128xf32>
    %154 = arith.mulf %153, %149 : vector<8x128xf32>
    %155 = arith.mulf %154, %149 : vector<8x128xf32>
    %156 = arith.addf %149, %155 : vector<8x128xf32>
    %cst_51 = arith.constant 0.797884583 : f32
    %157 = vector.broadcast %cst_51 : f32 to vector<8x128xf32>
    %158 = arith.mulf %157, %156 : vector<8x128xf32>
    %159 = math.tanh %158 : vector<8x128xf32>
    %cst_52 = arith.constant 1.000000e+00 : f32
    %160 = vector.broadcast %cst_52 : f32 to vector<8x128xf32>
    %161 = arith.addf %160, %159 : vector<8x128xf32>
    %162 = arith.mulf %151, %161 : vector<8x128xf32>
    %cst_53 = arith.constant dense<0.000000e+00> : vector<8x128xf32>
    %163 = tpu.matmul %162, %35, %cst_53 {dimension_numbers = #tpu.dot_dimension_numbers<[1], [0], [0], [1], [0, 0, 1, 1], [], []>} : vector<8x128xf32>, vector<128x128xbf16>, vector<8x128xf32> -> vector<8x128xf32>
    %164 = vector.broadcast %42 : vector<1x128xf32> to vector<8x128xf32>
    %165 = arith.addf %163, %164 : vector<8x128xf32>
    %166 = arith.addf %146, %165 : vector<8x128xf32>
    %cst_54 = arith.constant dense<0.000000e+00> : vector<8xf32>
    %167 = vector.multi_reduction <add>, %166, %cst_54 [1] : vector<8x128xf32> to vector<8xf32>
    %168 = vector.shape_cast %167 : vector<8xf32> to vector<8x1xf32>
    %cst_55 = arith.constant 3.125000e-02 : f32
    %169 = vector.broadcast %cst_55 : f32 to vector<8x1xf32>
    %170 = arith.mulf %168, %169 : vector<8x1xf32>
    %171 = vector.broadcast %170 : vector<8x1xf32> to vector<8x128xf32>
    %172 = arith.subf %166, %171 : vector<8x128xf32>
    %173 = vector.broadcast %31 : vector<1x128xf32> to vector<8x128xf32>
    %174 = arith.mulf %172, %173 : vector<8x128xf32>
    %175 = arith.mulf %174, %174 : vector<8x128xf32>
    %cst_56 = arith.constant dense<0.000000e+00> : vector<8xf32>
    %176 = vector.multi_reduction <add>, %175, %cst_56 [1] : vector<8x128xf32> to vector<8xf32>
    %177 = vector.shape_cast %176 : vector<8xf32> to vector<8x1xf32>
    %cst_57 = arith.constant 3.125000e-02 : f32
    %178 = vector.broadcast %cst_57 : f32 to vector<8x1xf32>
    %179 = arith.mulf %177, %178 : vector<8x1xf32>
    %cst_58 = arith.constant 9.99999974E-6 : f32
    %180 = vector.broadcast %cst_58 : f32 to vector<8x1xf32>
    %181 = arith.addf %179, %180 : vector<8x1xf32>
    %182 = math.rsqrt %181 : vector<8x1xf32>
    %183 = vector.broadcast %182 : vector<8x1xf32> to vector<8x128xf32>
    %184 = arith.mulf %174, %183 : vector<8x128xf32>
    %185 = vector.broadcast %43 : vector<1x128xf32> to vector<8x128xf32>
    %186 = arith.mulf %184, %185 : vector<8x128xf32>
    %187 = vector.broadcast %44 : vector<1x128xf32> to vector<8x128xf32>
    %188 = arith.addf %186, %187 : vector<8x128xf32>
    %c576 = arith.constant 576 : index
    %c0_59 = arith.constant 0 : index
    %189 = vector.load %arg4[%c576, %c0_59] : memref<992x128xbf16, #tpu.memory_space<vmem>>, vector<128x128xbf16>
    %c704 = arith.constant 704 : index
    %c0_60 = arith.constant 0 : index
    %190 = vector.load %arg4[%c704, %c0_60] : memref<992x128xbf16, #tpu.memory_space<vmem>>, vector<32x128xbf16>
    %c736 = arith.constant 736 : index
    %c0_61 = arith.constant 0 : index
    %191 = vector.load %arg4[%c736, %c0_61] : memref<992x128xbf16, #tpu.memory_space<vmem>>, vector<128x128xbf16>
    %c864 = arith.constant 864 : index
    %c0_62 = arith.constant 0 : index
    %192 = vector.load %arg4[%c864, %c0_62] : memref<992x128xbf16, #tpu.memory_space<vmem>>, vector<128x128xbf16>
    %c8 = arith.constant 8 : index
    %c0_63 = arith.constant 0 : index
    %193 = vector.load %arg5[%c8, %c0_63] : memref<16x128xf32, #tpu.memory_space<vmem>>, vector<8x128xf32>
    %194 = vector.extract_strided_slice %193 {offsets = [0, 0], sizes = [1, 128], strides = [1, 1]} : vector<8x128xf32> to vector<1x128xf32>
    %195 = vector.extract_strided_slice %193 {offsets = [1, 0], sizes = [1, 128], strides = [1, 1]} : vector<8x128xf32> to vector<1x128xf32>
    %196 = vector.extract_strided_slice %193 {offsets = [2, 0], sizes = [1, 128], strides = [1, 1]} : vector<8x128xf32> to vector<1x128xf32>
    %197 = vector.extract_strided_slice %193 {offsets = [3, 0], sizes = [1, 128], strides = [1, 1]} : vector<8x128xf32> to vector<1x128xf32>
    %198 = vector.extract_strided_slice %193 {offsets = [4, 0], sizes = [1, 128], strides = [1, 1]} : vector<8x128xf32> to vector<1x128xf32>
    %199 = vector.extract_strided_slice %193 {offsets = [5, 0], sizes = [1, 128], strides = [1, 1]} : vector<8x128xf32> to vector<1x128xf32>
    %200 = vector.extract_strided_slice %193 {offsets = [6, 0], sizes = [1, 128], strides = [1, 1]} : vector<8x128xf32> to vector<1x128xf32>
    %201 = vector.extract_strided_slice %193 {offsets = [7, 0], sizes = [1, 128], strides = [1, 1]} : vector<8x128xf32> to vector<1x128xf32>
    %cst_64 = arith.constant dense<0.000000e+00> : vector<8x128xf32>
    %202 = tpu.matmul %188, %189, %cst_64 {dimension_numbers = #tpu.dot_dimension_numbers<[1], [0], [0], [1], [0, 0, 1, 1], [], []>} : vector<8x128xf32>, vector<128x128xbf16>, vector<8x128xf32> -> vector<8x128xf32>
    %203 = vector.broadcast %194 : vector<1x128xf32> to vector<8x128xf32>
    %204 = arith.addf %202, %203 : vector<8x128xf32>
    %205 = vector.extract_strided_slice %204 {offsets = [0, 0], sizes = [8, 8], strides = [1, 1]} : vector<8x128xf32> to vector<8x8xf32>
    %206 = vector.extract_strided_slice %204 {offsets = [0, 32], sizes = [8, 8], strides = [1, 1]} : vector<8x128xf32> to vector<8x8xf32>
    %207 = vector.extract_strided_slice %204 {offsets = [0, 64], sizes = [8, 8], strides = [1, 1]} : vector<8x128xf32> to vector<8x8xf32>
    %208 = tpu.transpose %206, [1, 0] : vector<8x8xf32> -> vector<8x8xf32>
    %cst_65 = arith.constant dense<0.000000e+00> : vector<8x8xf32>
    %209 = tpu.matmul %205, %208, %cst_65 {dimension_numbers = #tpu.dot_dimension_numbers<[1], [0], [0], [1], [0, 0, 1, 1], [], []>} : vector<8x8xf32>, vector<8x8xf32>, vector<8x8xf32> -> vector<8x8xf32>
    %210 = vector.broadcast %25 : vector<1x8xf32> to vector<8x8xf32>
    %211 = arith.addf %209, %210 : vector<8x8xf32>
    %cst_66 = arith.constant dense<0xFF800000> : vector<8xf32>
    %212 = vector.multi_reduction <maximumf>, %211, %cst_66 [1] : vector<8x8xf32> to vector<8xf32>
    %213 = vector.shape_cast %212 : vector<8xf32> to vector<8x1xf32>
    %214 = vector.broadcast %213 : vector<8x1xf32> to vector<8x8xf32>
    %215 = arith.subf %211, %214 : vector<8x8xf32>
    %216 = math.exp %215 : vector<8x8xf32>
    %cst_67 = arith.constant dense<0.000000e+00> : vector<8xf32>
    %217 = vector.multi_reduction <add>, %216, %cst_67 [1] : vector<8x8xf32> to vector<8xf32>
    %218 = vector.shape_cast %217 : vector<8xf32> to vector<8x1xf32>
    %219 = tpu.reciprocal %218 {approx = true} : vector<8x1xf32> -> vector<8x1xf32>
    %220 = vector.broadcast %219 : vector<8x1xf32> to vector<8x8xf32>
    %221 = arith.mulf %216, %220 : vector<8x8xf32>
    %cst_68 = arith.constant dense<0.000000e+00> : vector<8x8xf32>
    %222 = tpu.matmul %221, %207, %cst_68 {dimension_numbers = #tpu.dot_dimension_numbers<[1], [0], [0], [1], [0, 0, 1, 1], [], []>} : vector<8x8xf32>, vector<8x8xf32>, vector<8x8xf32> -> vector<8x8xf32>
    %223 = vector.extract_strided_slice %204 {offsets = [0, 8], sizes = [8, 8], strides = [1, 1]} : vector<8x128xf32> to vector<8x8xf32>
    %224 = vector.extract_strided_slice %204 {offsets = [0, 40], sizes = [8, 8], strides = [1, 1]} : vector<8x128xf32> to vector<8x8xf32>
    %225 = vector.extract_strided_slice %204 {offsets = [0, 72], sizes = [8, 8], strides = [1, 1]} : vector<8x128xf32> to vector<8x8xf32>
    %226 = tpu.transpose %224, [1, 0] : vector<8x8xf32> -> vector<8x8xf32>
    %cst_69 = arith.constant dense<0.000000e+00> : vector<8x8xf32>
    %227 = tpu.matmul %223, %226, %cst_69 {dimension_numbers = #tpu.dot_dimension_numbers<[1], [0], [0], [1], [0, 0, 1, 1], [], []>} : vector<8x8xf32>, vector<8x8xf32>, vector<8x8xf32> -> vector<8x8xf32>
    %228 = vector.broadcast %25 : vector<1x8xf32> to vector<8x8xf32>
    %229 = arith.addf %227, %228 : vector<8x8xf32>
    %cst_70 = arith.constant dense<0xFF800000> : vector<8xf32>
    %230 = vector.multi_reduction <maximumf>, %229, %cst_70 [1] : vector<8x8xf32> to vector<8xf32>
    %231 = vector.shape_cast %230 : vector<8xf32> to vector<8x1xf32>
    %232 = vector.broadcast %231 : vector<8x1xf32> to vector<8x8xf32>
    %233 = arith.subf %229, %232 : vector<8x8xf32>
    %234 = math.exp %233 : vector<8x8xf32>
    %cst_71 = arith.constant dense<0.000000e+00> : vector<8xf32>
    %235 = vector.multi_reduction <add>, %234, %cst_71 [1] : vector<8x8xf32> to vector<8xf32>
    %236 = vector.shape_cast %235 : vector<8xf32> to vector<8x1xf32>
    %237 = tpu.reciprocal %236 {approx = true} : vector<8x1xf32> -> vector<8x1xf32>
    %238 = vector.broadcast %237 : vector<8x1xf32> to vector<8x8xf32>
    %239 = arith.mulf %234, %238 : vector<8x8xf32>
    %cst_72 = arith.constant dense<0.000000e+00> : vector<8x8xf32>
    %240 = tpu.matmul %239, %225, %cst_72 {dimension_numbers = #tpu.dot_dimension_numbers<[1], [0], [0], [1], [0, 0, 1, 1], [], []>} : vector<8x8xf32>, vector<8x8xf32>, vector<8x8xf32> -> vector<8x8xf32>
    %241 = vector.extract_strided_slice %204 {offsets = [0, 16], sizes = [8, 8], strides = [1, 1]} : vector<8x128xf32> to vector<8x8xf32>
    %242 = vector.extract_strided_slice %204 {offsets = [0, 48], sizes = [8, 8], strides = [1, 1]} : vector<8x128xf32> to vector<8x8xf32>
    %243 = vector.extract_strided_slice %204 {offsets = [0, 80], sizes = [8, 8], strides = [1, 1]} : vector<8x128xf32> to vector<8x8xf32>
    %244 = tpu.transpose %242, [1, 0] : vector<8x8xf32> -> vector<8x8xf32>
    %cst_73 = arith.constant dense<0.000000e+00> : vector<8x8xf32>
    %245 = tpu.matmul %241, %244, %cst_73 {dimension_numbers = #tpu.dot_dimension_numbers<[1], [0], [0], [1], [0, 0, 1, 1], [], []>} : vector<8x8xf32>, vector<8x8xf32>, vector<8x8xf32> -> vector<8x8xf32>
    %246 = vector.broadcast %25 : vector<1x8xf32> to vector<8x8xf32>
    %247 = arith.addf %245, %246 : vector<8x8xf32>
    %cst_74 = arith.constant dense<0xFF800000> : vector<8xf32>
    %248 = vector.multi_reduction <maximumf>, %247, %cst_74 [1] : vector<8x8xf32> to vector<8xf32>
    %249 = vector.shape_cast %248 : vector<8xf32> to vector<8x1xf32>
    %250 = vector.broadcast %249 : vector<8x1xf32> to vector<8x8xf32>
    %251 = arith.subf %247, %250 : vector<8x8xf32>
    %252 = math.exp %251 : vector<8x8xf32>
    %cst_75 = arith.constant dense<0.000000e+00> : vector<8xf32>
    %253 = vector.multi_reduction <add>, %252, %cst_75 [1] : vector<8x8xf32> to vector<8xf32>
    %254 = vector.shape_cast %253 : vector<8xf32> to vector<8x1xf32>
    %255 = tpu.reciprocal %254 {approx = true} : vector<8x1xf32> -> vector<8x1xf32>
    %256 = vector.broadcast %255 : vector<8x1xf32> to vector<8x8xf32>
    %257 = arith.mulf %252, %256 : vector<8x8xf32>
    %cst_76 = arith.constant dense<0.000000e+00> : vector<8x8xf32>
    %258 = tpu.matmul %257, %243, %cst_76 {dimension_numbers = #tpu.dot_dimension_numbers<[1], [0], [0], [1], [0, 0, 1, 1], [], []>} : vector<8x8xf32>, vector<8x8xf32>, vector<8x8xf32> -> vector<8x8xf32>
    %259 = vector.extract_strided_slice %204 {offsets = [0, 24], sizes = [8, 8], strides = [1, 1]} : vector<8x128xf32> to vector<8x8xf32>
    %260 = vector.extract_strided_slice %204 {offsets = [0, 56], sizes = [8, 8], strides = [1, 1]} : vector<8x128xf32> to vector<8x8xf32>
    %261 = vector.extract_strided_slice %204 {offsets = [0, 88], sizes = [8, 8], strides = [1, 1]} : vector<8x128xf32> to vector<8x8xf32>
    %262 = tpu.transpose %260, [1, 0] : vector<8x8xf32> -> vector<8x8xf32>
    %cst_77 = arith.constant dense<0.000000e+00> : vector<8x8xf32>
    %263 = tpu.matmul %259, %262, %cst_77 {dimension_numbers = #tpu.dot_dimension_numbers<[1], [0], [0], [1], [0, 0, 1, 1], [], []>} : vector<8x8xf32>, vector<8x8xf32>, vector<8x8xf32> -> vector<8x8xf32>
    %264 = vector.broadcast %25 : vector<1x8xf32> to vector<8x8xf32>
    %265 = arith.addf %263, %264 : vector<8x8xf32>
    %cst_78 = arith.constant dense<0xFF800000> : vector<8xf32>
    %266 = vector.multi_reduction <maximumf>, %265, %cst_78 [1] : vector<8x8xf32> to vector<8xf32>
    %267 = vector.shape_cast %266 : vector<8xf32> to vector<8x1xf32>
    %268 = vector.broadcast %267 : vector<8x1xf32> to vector<8x8xf32>
    %269 = arith.subf %265, %268 : vector<8x8xf32>
    %270 = math.exp %269 : vector<8x8xf32>
    %cst_79 = arith.constant dense<0.000000e+00> : vector<8xf32>
    %271 = vector.multi_reduction <add>, %270, %cst_79 [1] : vector<8x8xf32> to vector<8xf32>
    %272 = vector.shape_cast %271 : vector<8xf32> to vector<8x1xf32>
    %273 = tpu.reciprocal %272 {approx = true} : vector<8x1xf32> -> vector<8x1xf32>
    %274 = vector.broadcast %273 : vector<8x1xf32> to vector<8x8xf32>
    %275 = arith.mulf %270, %274 : vector<8x8xf32>
    %cst_80 = arith.constant dense<0.000000e+00> : vector<8x8xf32>
    %276 = tpu.matmul %275, %261, %cst_80 {dimension_numbers = #tpu.dot_dimension_numbers<[1], [0], [0], [1], [0, 0, 1, 1], [], []>} : vector<8x8xf32>, vector<8x8xf32>, vector<8x8xf32> -> vector<8x8xf32>
    %277 = tpu.concatenate %222, %240, %258, %276 in 1 : vector<8x8xf32>, vector<8x8xf32>, vector<8x8xf32>, vector<8x8xf32> -> vector<8x32xf32>
    %cst_81 = arith.constant dense<0.000000e+00> : vector<8x128xf32>
    %278 = tpu.matmul %277, %190, %cst_81 {dimension_numbers = #tpu.dot_dimension_numbers<[1], [0], [0], [1], [0, 0, 1, 1], [], []>} : vector<8x32xf32>, vector<32x128xbf16>, vector<8x128xf32> -> vector<8x128xf32>
    %279 = vector.broadcast %195 : vector<1x128xf32> to vector<8x128xf32>
    %280 = arith.addf %278, %279 : vector<8x128xf32>
    %281 = arith.addf %188, %280 : vector<8x128xf32>
    %cst_82 = arith.constant dense<0.000000e+00> : vector<8xf32>
    %282 = vector.multi_reduction <add>, %281, %cst_82 [1] : vector<8x128xf32> to vector<8xf32>
    %283 = vector.shape_cast %282 : vector<8xf32> to vector<8x1xf32>
    %cst_83 = arith.constant 3.125000e-02 : f32
    %284 = vector.broadcast %cst_83 : f32 to vector<8x1xf32>
    %285 = arith.mulf %283, %284 : vector<8x1xf32>
    %286 = vector.broadcast %285 : vector<8x1xf32> to vector<8x128xf32>
    %287 = arith.subf %281, %286 : vector<8x128xf32>
    %288 = vector.broadcast %31 : vector<1x128xf32> to vector<8x128xf32>
    %289 = arith.mulf %287, %288 : vector<8x128xf32>
    %290 = arith.mulf %289, %289 : vector<8x128xf32>
    %cst_84 = arith.constant dense<0.000000e+00> : vector<8xf32>
    %291 = vector.multi_reduction <add>, %290, %cst_84 [1] : vector<8x128xf32> to vector<8xf32>
    %292 = vector.shape_cast %291 : vector<8xf32> to vector<8x1xf32>
    %cst_85 = arith.constant 3.125000e-02 : f32
    %293 = vector.broadcast %cst_85 : f32 to vector<8x1xf32>
    %294 = arith.mulf %292, %293 : vector<8x1xf32>
    %cst_86 = arith.constant 9.99999974E-6 : f32
    %295 = vector.broadcast %cst_86 : f32 to vector<8x1xf32>
    %296 = arith.addf %294, %295 : vector<8x1xf32>
    %297 = math.rsqrt %296 : vector<8x1xf32>
    %298 = vector.broadcast %297 : vector<8x1xf32> to vector<8x128xf32>
    %299 = arith.mulf %289, %298 : vector<8x128xf32>
    %300 = vector.broadcast %196 : vector<1x128xf32> to vector<8x128xf32>
    %301 = arith.mulf %299, %300 : vector<8x128xf32>
    %302 = vector.broadcast %197 : vector<1x128xf32> to vector<8x128xf32>
    %303 = arith.addf %301, %302 : vector<8x128xf32>
    %cst_87 = arith.constant dense<0.000000e+00> : vector<8x128xf32>
    %304 = tpu.matmul %303, %191, %cst_87 {dimension_numbers = #tpu.dot_dimension_numbers<[1], [0], [0], [1], [0, 0, 1, 1], [], []>} : vector<8x128xf32>, vector<128x128xbf16>, vector<8x128xf32> -> vector<8x128xf32>
    %305 = vector.broadcast %198 : vector<1x128xf32> to vector<8x128xf32>
    %306 = arith.addf %304, %305 : vector<8x128xf32>
    %cst_88 = arith.constant 5.000000e-01 : f32
    %307 = vector.broadcast %cst_88 : f32 to vector<8x128xf32>
    %308 = arith.mulf %307, %306 : vector<8x128xf32>
    %cst_89 = arith.constant 4.471500e-02 : f32
    %309 = vector.broadcast %cst_89 : f32 to vector<8x128xf32>
    %310 = arith.mulf %309, %306 : vector<8x128xf32>
    %311 = arith.mulf %310, %306 : vector<8x128xf32>
    %312 = arith.mulf %311, %306 : vector<8x128xf32>
    %313 = arith.addf %306, %312 : vector<8x128xf32>
    %cst_90 = arith.constant 0.797884583 : f32
    %314 = vector.broadcast %cst_90 : f32 to vector<8x128xf32>
    %315 = arith.mulf %314, %313 : vector<8x128xf32>
    %316 = math.tanh %315 : vector<8x128xf32>
    %cst_91 = arith.constant 1.000000e+00 : f32
    %317 = vector.broadcast %cst_91 : f32 to vector<8x128xf32>
    %318 = arith.addf %317, %316 : vector<8x128xf32>
    %319 = arith.mulf %308, %318 : vector<8x128xf32>
    %cst_92 = arith.constant dense<0.000000e+00> : vector<8x128xf32>
    %320 = tpu.matmul %319, %192, %cst_92 {dimension_numbers = #tpu.dot_dimension_numbers<[1], [0], [0], [1], [0, 0, 1, 1], [], []>} : vector<8x128xf32>, vector<128x128xbf16>, vector<8x128xf32> -> vector<8x128xf32>
    %321 = vector.broadcast %199 : vector<1x128xf32> to vector<8x128xf32>
    %322 = arith.addf %320, %321 : vector<8x128xf32>
    %323 = arith.addf %303, %322 : vector<8x128xf32>
    %cst_93 = arith.constant dense<0.000000e+00> : vector<8xf32>
    %324 = vector.multi_reduction <add>, %323, %cst_93 [1] : vector<8x128xf32> to vector<8xf32>
    %325 = vector.shape_cast %324 : vector<8xf32> to vector<8x1xf32>
    %cst_94 = arith.constant 3.125000e-02 : f32
    %326 = vector.broadcast %cst_94 : f32 to vector<8x1xf32>
    %327 = arith.mulf %325, %326 : vector<8x1xf32>
    %328 = vector.broadcast %327 : vector<8x1xf32> to vector<8x128xf32>
    %329 = arith.subf %323, %328 : vector<8x128xf32>
    %330 = vector.broadcast %31 : vector<1x128xf32> to vector<8x128xf32>
    %331 = arith.mulf %329, %330 : vector<8x128xf32>
    %332 = arith.mulf %331, %331 : vector<8x128xf32>
    %cst_95 = arith.constant dense<0.000000e+00> : vector<8xf32>
    %333 = vector.multi_reduction <add>, %332, %cst_95 [1] : vector<8x128xf32> to vector<8xf32>
    %334 = vector.shape_cast %333 : vector<8xf32> to vector<8x1xf32>
    %cst_96 = arith.constant 3.125000e-02 : f32
    %335 = vector.broadcast %cst_96 : f32 to vector<8x1xf32>
    %336 = arith.mulf %334, %335 : vector<8x1xf32>
    %cst_97 = arith.constant 9.99999974E-6 : f32
    %337 = vector.broadcast %cst_97 : f32 to vector<8x1xf32>
    %338 = arith.addf %336, %337 : vector<8x1xf32>
    %339 = math.rsqrt %338 : vector<8x1xf32>
    %340 = vector.broadcast %339 : vector<8x1xf32> to vector<8x128xf32>
    %341 = arith.mulf %331, %340 : vector<8x128xf32>
    %342 = vector.broadcast %200 : vector<1x128xf32> to vector<8x128xf32>
    %343 = arith.mulf %341, %342 : vector<8x128xf32>
    %344 = vector.broadcast %201 : vector<1x128xf32> to vector<8x128xf32>
    %345 = arith.addf %343, %344 : vector<8x128xf32>
    %c0_98 = arith.constant 0 : index
    %c0_99 = arith.constant 0 : index
    %c0_100 = arith.constant 0 : index
    %346 = vector.load %arg6[%c0_98, %c0_99, %c0_100] : memref<1x8x128xf32, #tpu.memory_space<vmem>>, vector<1x8x128xf32>
    %347 = vector.shape_cast %346 : vector<1x8x128xf32> to vector<8x128xf32>
    %348 = vector.shape_cast %345 : vector<8x128xf32> to vector<1x8x128xf32>
    tpu.vector_store %arg6[%c0_98, %c0_99, %c0_100], %348 {strides = array<i32>} : memref<1x8x128xf32, #tpu.memory_space<vmem>>, vector<1x8x128xf32>,
    return
  }
  func.func @transform_0(%arg0: i32) -> (i32, i32, i32) {
    %c0_i32 = arith.constant 0 : i32
    %c0_i32_0 = arith.constant 0 : i32
    %c0_i32_1 = arith.constant 0 : i32
    return %arg0, %c0_i32, %c0_i32_0 : i32, i32, i32
  }
  func.func @transform_1(%arg0: i32) -> (i32, i32, i32) {
    %c0_i32 = arith.constant 0 : i32
    %c0_i32_0 = arith.constant 0 : i32
    %c0_i32_1 = arith.constant 0 : i32
    return %arg0, %c0_i32, %c0_i32_0 : i32, i32, i32
  }
  func.func @transform_2(%arg0: i32) -> (i32, i32, i32) {
    %c0_i32 = arith.constant 0 : i32
    %c0_i32_0 = arith.constant 0 : i32
    %c0_i32_1 = arith.constant 0 : i32
    return %arg0, %c0_i32, %c0_i32_0 : i32, i32, i32
  }
  func.func @transform_3(%arg0: i32) -> (i32, i32) {
    %c0_i32 = arith.constant 0 : i32
    %c0_i32_0 = arith.constant 0 : i32
    %c0_i32_1 = arith.constant 0 : i32
    return %c0_i32, %c0_i32_0 : i32, i32
  }
  func.func @transform_4(%arg0: i32) -> (i32, i32) {
    %c0_i32 = arith.constant 0 : i32
    %c0_i32_0 = arith.constant 0 : i32
    %c0_i32_1 = arith.constant 0 : i32
    return %c0_i32, %c0_i32_0 : i32, i32
  }
  func.func @transform_5(%arg0: i32) -> (i32, i32, i32) {
    %c0_i32 = arith.constant 0 : i32
    %c0_i32_0 = arith.constant 0 : i32
    %c0_i32_1 = arith.constant 0 : i32
    return %arg0, %c0_i32, %c0_i32_0 : i32, i32, i32
  }
}

</mosaic_0001>

<bundles_post_ra>
// kernel: _encode.1
= control target key start
LH: loop header
LB: loop body
LE: loop exit
PB: predicated region body
PF: predicated region fallthrough
CT: control target
= control target key end

     0   :  { %10 = vsyncpa [#allocation3], 0  ;;  %s3468_s0 = inlined_call_operand.vmem [shape: s32[1,8,1], index: 0, kind: input, shape index: {}]   ;;  %s3469_s1 = inlined_call_operand.vmem [shape: s32[1,8,1], index: 1, kind: input, shape index: {}]   ;;  %s3470_s2 = inlined_call_operand.vmem [shape: f32[1,1,8], index: 2, kind: input, shape index: {}]   ;;  %s3471_s3 = inlined_call_operand.hbm [shape: bf16[992,128], index: 3, kind: input, shape index: {}]   ;;  %s3472_s4 = inlined_call_operand.vmem [shape: f32[16,128], index: 4, kind: input, shape index: {}]   ;;  %s3473_s5 = inlined_call_operand.hbm [shape: f32[1,8,128], index: 5, kind: output, shape index: {}]  }
   0x1   :  { %11 = vsyncpa [#allocation4], 0  ;;  %s3046_s18 = smov [#allocation2]   ;;  %s2998_s22 = scalar_lea.hbm %s3471_s3, 7936 }
   0x2   :  { %s23_s19 = sshll.u32 %s3046_s18, 4  ;;  %p2999_p0 = scmp.ne.s32.totalorder %s3471_s3, %s2998_s22  ;;  %s24_s19 = int_to_ptr.vmem [resolvable:$true] %s23_s19 }
   0x3   :  { %p3002_p1 = scmp.lt.u32.totalorder %s2998_s22, %s3471_s3 }
   0x5   :  { %p3004_p2 = pnand %p3002_p1, %p2999_p0 }
   0x7   :  { %3007 = shalt.err (!%p3004_p2)
}
   0x8   :  { %s3008_s27 = scalar_lea.vmem %s24_s19, 7936  ;;  %p3013_p4 = scmp.lt.s32.totalorder %s24_s19, %s24_s19 }
   0x9   :  { %p3009_p3 = scmp.ne.s32.totalorder %s24_s19, %s3008_s27  ;;  %p3014_p5 = scmp.lt.s32.totalorder %s3008_s27, %s3008_s27 }
   0xb   :  { %p3015_p6 = por %p3014_p5, %p3013_p4 }
   0xd   :  { %p3016_p7 = pnand %p3015_p6, %p3009_p3 }
   0xf   :  { %3019 = shalt.err (!%p3016_p7)
}
  0x10   :  { %s3047_s28 = smov 64   ;;  %s3048_s29 = smov 4  }
  0x11   :  { %29 = dma.hbm_to_vmem [thread:$0]  %s3471_s3, 7936, %s24_s19, [#allocation3], %s3047_s28, %s3047_s28, %s3048_s29  }
  0x12   :  { %3042 = dma.done.wait [#allocation3], 7936  }
  0x13   :  { %3043 = vsyncadd [#allocation3], 4294959360  ;;  %v3049_v0 = vmov 0   ;;  %v3050_v1 = vmov 0.0   ;;  %v37_v2 = vld [vmem:[%s3469_s1] sm:$0xff]  ;;  %v2894_v3 = vld [vmem:[#allocation2] sm:$0xff]   ;;  %v38_v14 = vlaneseq }
  0x14   :  { %2893 = vset.pattern.permute.xlu0 %v3049_v0  ;;  %2645 = vmatprep.subr.bf16.mxu1 %v3050_v1  ;;  %v36_v4 = vld [vmem:[%s3468_s0] sm:$0xff]  ;;  %vm3051_vm0 = vmmov 0   ;;  %v2895_v5 = vld [vmem:[#allocation2 + $0x8] sm:$0xff]   ;;  %vm71_vm1 = vcmask 1043456   ;;  %v2896_v6 = vld [vmem:[#allocation2 + $0x10] sm:$0xff]   ;;  %vm67_vm2 = vcmask 64512  }
  0x15   :  { %2640 = vmatprep.subr.bf16.mxu0 %v3050_v1  ;;  %46 = vperm.xlu0 %2893, %v37_v2   ;;  %v66_v7 = vld [vmem:[#allocation2 + $0x48] sm:$0xf]  ;;  %v2897_v9 = vld [vmem:[#allocation2 + $0x18] sm:$0xff]   ;;  %v2898_v10 = vld [vmem:[#allocation2 + $0x20] sm:$0xff]   ;;  %v3132_v15 = vand.u32 127, %v38_v14  ;;  %v3052_v21 = vmov 1.0  }
  0x16   :  { %2642 = vmatprep.mubr.msk.f32.mxu0 %vm3051_vm0, %v3050_v1  ;;  %2661 = vmatprep.mubr.msk.f32.mxu1 %vm3051_vm0, %v3050_v1  ;;  %v73_v8 = vsel %vm71_vm1, %v66_v7, 0  ;;  %v2899_v11 = vld [vmem:[#allocation2 + $0x28] sm:$0xff]   ;;  %v2900_v12 = vld [vmem:[#allocation2 + $0x30] sm:$0xff]   ;;  %v2901_v13 = vld [vmem:[#allocation2 + $0x38] sm:$0xff]   ;;  %v3155_v36 = vshrl.u32 %v38_v14, 7  ;;  %s3053_s3 = smov 120  }
  0x17   :  { %2646 = vmatpush3.bf16.msra.mxu1 %v2894_v3  ;;  %2641 = vmatpush3.bf16.msra.mxu0 %v73_v8  ;;  %v2902_v17 = vld [vmem:[#allocation2 + $0x50] sm:$0xff]   ;;  %v2903_v20 = vld [vmem:[#allocation2 + $0x58] sm:$0xff]   ;;  %v2904_v22 = vld [vmem:[#allocation2 + $0x60] sm:$0xff]   ;;  %s3054_s11 = smov 96   ;;  %s3055_s12 = smov 112   ;;  %vm1026_vm5 = vcmask 130048  }
  0x18   :  { %2647 = vmatprep.subr.bf16.mxu1 %v3050_v1  ;;  %2664 = vmatprep.subr.bf16.mxu0 %v3050_v1  ;;  %v2905_v23 = vld [vmem:[#allocation2 + $0x68] sm:$0xff]   ;;  %v2906_v24 = vld [vmem:[#allocation2 + $0x70] sm:$0xff]   ;;  %v2907_v25 = vld [vmem:[#allocation2 + $0x78] sm:$0xff]   ;;  %v260_v37 = vsub.s32 0, %v3155_v36  ;;  %s3056_s13 = smov 88   ;;  %s3057_s14 = smov 104  }
  0x19   :  { %41 = vperm.xlu0 %2893, %v36_v4   ;;  %v2908_v26 = vld [vmem:[#allocation2 + $0x80] sm:$0xff]   ;;  %v2909_v27 = vld [vmem:[#allocation2 + $0x88] sm:$0xff]   ;;  %v3161_v38 = vld [vmem:[%s3472_s4] sm:$0xff]  ;;  %s3058_s15 = smov 80   ;;  %s3059_s16 = smov 72   ;;  %vm1028_vm6 = vcmask 195584  }
  0x1a   :  { %v199_v28 = vld [vmem:[#allocation2 + $0x40] sm:$0xf]  ;;  %v261_v39 = vrot.slane %v3161_v38, %v260_v37  ;;  %v3206_v50 = vld [vmem:[%s3470_s2] ss:$0 sm:$0xff]  ;;  %s3060_s2 = smov 56   ;;  %s3061_s19 = smov 48  }
  0x1b   :  { %2648 = vmatpush3.bf16.msra.mxu1 %v2895_v5  ;;  %v200_v31 = vunpack.c.l.bf16 %v199_v28  ;;  %s3062_s20 = smov 40   ;;  %s3063_s21 = smov 8   ;;  %vm1046_vm7 = vcmask 261120   ;;  %vm203_vm8 = vcmp.lt.s32.totalorder %v3132_v15, 32 }
  0x1c   :  { %2649 = vmatprep.subr.bf16.mxu1 %v3050_v1  ;;  %s3064_s22 = smov 16   ;;  %s3065_s23 = smov 24  }
  0x1f   :  { %2650 = vmatpush3.bf16.msra.mxu1 %v2896_v6 }
  0x20   :  { %2651 = vmatprep.subr.bf16.mxu1 %v3050_v1 }
  0x23   :  { %2652 = vmatpush3.bf16.msra.mxu1 %v2897_v9 }
  0x24   :  { %2653 = vmatprep.subr.bf16.mxu1 %v3050_v1 }
  0x27   :  { %2654 = vmatpush3.bf16.msra.mxu1 %v2898_v10 }
  0x28   :  { %2655 = vmatprep.subr.bf16.mxu1 %v3050_v1 }
  0x2b   :  { %2656 = vmatpush3.bf16.msra.mxu1 %v2899_v11 }
  0x2c   :  { %2657 = vmatprep.subr.bf16.mxu1 %v3050_v1 }
  0x2f   :  { %2658 = vmatpush3.bf16.msra.mxu1 %v2900_v12 }
  0x30   :  { %2659 = vmatprep.subr.bf16.mxu1 %v3050_v1 }
  0x33   :  { %2660 = vmatpush3.bf16.msra.mxu1 %v2901_v13 }
  0x34   :  { %2683 = vmatprep.subr.mxu1 %v3050_v1 }
  0x94   :  { %v47_v16 = vpop.permute.xlu0 %46 }
  0x95   :  { %vm48_vm3 = vcmp.eq.s32.totalorder %v3132_v15, %v47_v16 }
  0x96   :  { %v49_v18 = vsel %vm48_vm3, 1.0, %v3050_v1 }
  0x97   :  { %2643 = vmatmul.mubr.msk.f32.vlgmr.msra.gmra.mrb[0].mxu0 %vm67_vm2, %v49_v18 }
  0x98   :  { %v42_v19 = vpop.permute.xlu0 %41  ;;  %2665 = vmatpush3.bf16.msra.mxu0 %v2902_v17  ;;  %2680 = vmatprep.mubr.msk.f32.mxu0 %vm3051_vm0, %v3050_v1 }
  0x99   :  { %vm43_vm4 = vcmp.eq.s32.totalorder %v3132_v15, %v42_v19  ;;  %2666 = vmatprep.subr.bf16.mxu0 %v3050_v1  ;;  %v2918_v15 = vld [vmem:[#allocation2 + $0xd0] sm:$0xff]  }
  0x9a   :  { %2662 = vmatmul.mubr.msk.f32.vlgmr.msra.gmra.mrb[0].mxu1 %vm43_vm4, %v3052_v21 }
  0x9b   :  { %2685 = vmatprep.mubr.msk.f32.mxu1 %vm3051_vm0, %v3050_v1 }
  0x9c   :  { %2667 = vmatpush3.bf16.msra.mxu0 %v2903_v20 }
  0x9d   :  { %2668 = vmatprep.subr.bf16.mxu0 %v3050_v1 }
  0xa0   :  { %2669 = vmatpush3.bf16.msra.mxu0 %v2904_v22 }
  0xa1   :  { %2670 = vmatprep.subr.bf16.mxu0 %v3050_v1 }
  0xa4   :  { %2671 = vmatpush3.bf16.msra.mxu0 %v2905_v23 }
  0xa5   :  { %2672 = vmatprep.subr.bf16.mxu0 %v3050_v1 }
  0xa8   :  { %2673 = vmatpush3.bf16.msra.mxu0 %v2906_v24 }
  0xa9   :  { %2674 = vmatprep.subr.bf16.mxu0 %v3050_v1 }
  0xac   :  { %2675 = vmatpush3.bf16.msra.mxu0 %v2907_v25 }
  0xad   :  { %2676 = vmatprep.subr.bf16.mxu0 %v3050_v1 }
  0xb0   :  { %2677 = vmatpush3.bf16.msra.mxu0 %v2908_v26 }
  0xb1   :  { %2678 = vmatprep.subr.bf16.mxu0 %v3050_v1 }
  0xb4   :  { %2679 = vmatpush3.bf16.msra.mxu0 %v2909_v27 }
  0xb5   :  { %2688 = vmatprep.subr.mxu0 %v3050_v1 }
 0x16a   :  { %v109_v29 = vpop.f32.mrb[0].mxu0 }
 0x16b   :  { %v2644_v30 = vpop.f32.mrb[1].mxu0 }
 0x16d   :  { %v195_v32 = vpop.f32.mrb[0].mxu1 }
 0x16e   :  { %v196_v33 = vadd.f32 %v195_v32, %v109_v29  ;;  %v2663_v34 = vpop.f32.mrb[1].mxu1 }
 0x170   :  { %v3150_v35 = vadd.f32 %v200_v31, %v196_v33 }
 0x172   :  { %2681 = vmatmul.mubr.f32.vlgmr.msra.gmra.mrb[2].mxu0 %v3150_v35 }
 0x173   :  { %2690 = vmatprep.mubr.msk.f32.mxu0 %vm3051_vm0, %v3050_v1 }
 0x245   :  { %v344_v40 = vpop.f32.mrb[2].mxu0 }
 0x246   :  { %v3166_v41 = vadd.f32 %v344_v40, %v261_v39  ;;  %v2682_v42 = vpop.f32.mrb[3].mxu0 }
 0x248   :  { %518 = vrot.lane.b32.xlu0 %v3166_v41, %s3053_s3  ;;  %355 = vrot.lane.b32.xlu1 %v3166_v41, %s3054_s11 }
 0x24c   :  { %683 = vrot.lane.b32.xlu0 %v3166_v41, %s3055_s12  ;;  %520 = vrot.lane.b32.xlu1 %v3166_v41, %s3056_s13 }
 0x250   :  { %848 = vrot.lane.b32.xlu0 %v3166_v41, %s3057_s14  ;;  %685 = vrot.lane.b32.xlu1 %v3166_v41, %s3058_s15 }
 0x254   :  { %850 = vrot.lane.b32.xlu1 %v3166_v41, %s3059_s16 }
 0x2ba   :  { %v356_v43 = vpop.permute.xlu1 %355  ;;  %v519_v44 = vpop.permute.xlu0 %518 }
 0x2bb   :  { %2684 = vmatpush3.xpose.msk.msra.mxu1 %vm67_vm2, %v356_v43 }
 0x2bc   :  { %2693 = vmatprep.subr.mxu1 %v3050_v1 }
 0x2be   :  { %2686 = vmatmul.mubr.msk.f32.vlgmr.msra.gmra.mrb[2].mxu1 %vm67_vm2, %v3166_v41  ;;  %v521_v45 = vpop.permute.xlu1 %520  ;;  %v684_v47 = vpop.permute.xlu0 %683 }
 0x2bf   :  { %2694 = vmatpush3.xpose.msk.msra.mxu1 %vm67_vm2, %v521_v45  ;;  %2695 = vmatprep.mubr.msk.f32.mxu1 %vm3051_vm0, %v3050_v1  ;;  %v2910_v45 = vld [vmem:[#allocation2 + $0x90] sm:$0xff]  }
 0x2c0   :  { %2703 = vmatprep.subr.mxu1 %v3050_v1 }
 0x2c2   :  { %2696 = vmatmul.mubr.msk.f32.vlgmr.msra.gmra.mrb[4].mxu1 %vm67_vm2, %v519_v44  ;;  %v686_v46 = vpop.permute.xlu1 %685  ;;  %v849_v49 = vpop.permute.xlu0 %848 }
 0x2c3   :  { %2704 = vmatpush3.xpose.msk.msra.mxu1 %vm67_vm2, %v686_v46  ;;  %2705 = vmatprep.mubr.msk.f32.mxu1 %vm3051_vm0, %v3050_v1 }
 0x2c4   :  { %2713 = vmatprep.subr.mxu1 %v3050_v1 }
 0x2c6   :  { %2706 = vmatmul.mubr.msk.f32.vlgmr.msra.gmra.mrb[6].mxu1 %vm67_vm2, %v684_v47  ;;  %v851_v48 = vpop.permute.xlu1 %850 }
 0x2c7   :  { %2714 = vmatpush3.xpose.msk.msra.mxu1 %vm67_vm2, %v851_v48  ;;  %2715 = vmatprep.mubr.msk.f32.mxu1 %vm3051_vm0, %v3050_v1 }
 0x2c8   :  { %2723 = vmatprep.subr.bf16.mxu1 %v3050_v1 }
 0x2ca   :  { %2716 = vmatmul.mubr.msk.f32.vlgmr.msra.gmra.mrb[8].mxu1 %vm67_vm2, %v849_v49 }
 0x2cb   :  { %2727 = vmatprep.mubr.msk.f32.mxu1 %vm3051_vm0, %v3050_v1  ;;  %2724 = vmatpush3.bf16.msra.mxu1 %v2910_v45 }
 0x2cc   :  { %2725 = vmatprep.subr.bf16.mxu1 %v3050_v1 }
 0x391   :  { %v427_v51 = vpop.f32.mrb[2].mxu1 }
 0x392   :  { %v428_v52 = vadd.f32 %v3206_v50, %v427_v51  ;;  %v2687_v53 = vpop.f32.mrb[3].mxu1  ;;  %v2911_v51 = vld [vmem:[#allocation2 + $0x98] sm:$0xff]  }
 0x393   :  { %2726 = vmatpush3.bf16.msra.mxu1 %v2911_v51 }
 0x394   :  { %v431_v54 = vsel %vm67_vm2, %v428_v52, -inf  ;;  %2749 = vmatprep.subr.bf16.mxu1 %v3050_v1 }
 0x395   :  { %432 = vmax.xlane.f32.xlu1 %v431_v54  ;;  %v592_v55 = vpop.f32.mrb[4].mxu1 }
 0x396   :  { %v593_v56 = vadd.f32 %v3206_v50, %v592_v55  ;;  %v2697_v57 = vpop.f32.mrb[5].mxu1 }
 0x398   :  { %v596_v58 = vsel %vm67_vm2, %v593_v56, -inf }
 0x399   :  { %597 = vmax.xlane.f32.xlu0 %v596_v58  ;;  %v757_v59 = vpop.f32.mrb[6].mxu1 }
 0x39a   :  { %v758_v60 = vadd.f32 %v3206_v50, %v757_v59  ;;  %v2707_v61 = vpop.f32.mrb[7].mxu1 }
 0x39c   :  { %v761_v62 = vsel %vm67_vm2, %v758_v60, -inf }
 0x39d   :  { %762 = vmax.xlane.f32.xlu0 %v761_v62  ;;  %v922_v63 = vpop.f32.mrb[8].mxu1  ;;  %v1032_v62 = vsub.s32 1, %v3155_v36 }
 0x39e   :  { %v923_v0 = vadd.f32 %v3206_v50, %v922_v63  ;;  %v2717_v2 = vpop.f32.mrb[9].mxu1 }
 0x39f   :  { %v1033_v63 = vrot.slane %v3161_v38, %v1032_v62 }
 0x3a0   :  { %v926_v3 = vsel %vm67_vm2, %v923_v0, -inf }
 0x3a1   :  { %927 = vmax.xlane.f32.xlu1 %v926_v3 }
 0x3b2   :  { %607 = vrot.lane.b32.xlu1 %v3166_v41, %s3060_s2 }
 0x422   :  { %v433_v4 = vpop.xlane.xlu1 %432 }
 0x423   :  { %v434_v5 = vsub.f32 %v428_v52, %v433_v4 }
 0x425   :  { %v435_v6 = vmul.f32 1.442695, %v434_v5  ;;  %v2912_v5 = vld [vmem:[#allocation2 + $0xa0] sm:$0xff]  }
 0x426   :  { %v598_v7 = vpop.xlane.xlu0 %597 }
 0x427   :  { %2954 = vpow2.f32 %v435_v6  ;;  %v599_v8 = vsub.f32 %v593_v56, %v598_v7  ;;  %v2913_v6 = vld [vmem:[#allocation2 + $0xa8] sm:$0xff]   ;;  %v2914_v7 = vld [vmem:[#allocation2 + $0xb0] sm:$0xff]  }
 0x429   :  { %v600_v9 = vmul.f32 1.442695, %v599_v8 }
 0x42a   :  { %v763_v20 = vpop.xlane.xlu0 %762 }
 0x42b   :  { %2956 = vpow2.f32 %v600_v9  ;;  %v764_v21 = vsub.f32 %v758_v60, %v763_v20 }
 0x42d   :  { %v765_v22 = vmul.f32 1.442695, %v764_v21 }
 0x42e   :  { %v928_v10 = vpop.xlane.xlu1 %927 }
 0x42f   :  { %v929_v11 = vsub.f32 %v923_v0, %v928_v10  ;;  %v3265_v10 = vsel %vm203_vm8, 1.0, %v3050_v1 }
 0x431   :  { %v2955_v12 = vpop.eup %2954  ;;  %v930_v13 = vmul.f32 1.442695, %v929_v11 }
 0x432   :  { %v437_v14 = vsel %vm67_vm2, %v2955_v12, 0.0  ;;  %v608_v25 = vpop.permute.xlu1 %607 }
 0x433   :  { %2958 = vpow2.f32 %v930_v13  ;;  %438 = vadd.xlane.f32.xlu0 %v437_v14  ;;  %v2915_v13 = vld [vmem:[#allocation2 + $0xb8] sm:$0xff]   ;;  %v2916_v14 = vld [vmem:[#allocation2 + $0xc0] sm:$0xff]  }
 0x434   :  { %2960 = vpow2.f32 %v765_v22  ;;  %v1103_v22 = vsub.s32 2, %v3155_v36 }
 0x435   :  { %v2957_v16 = vpop.eup %2956 }
 0x436   :  { %v602_v17 = vsel %vm67_vm2, %v2957_v16, 0.0 }
 0x437   :  { %603 = vadd.xlane.f32.xlu1 %v602_v17  ;;  %v2919_v17 = vld [vmem:[#allocation2 + $0xd8] sm:$0xff]  }
 0x43d   :  { %v2959_v18 = vpop.eup %2958 }
 0x43e   :  { %v932_v19 = vsel %vm67_vm2, %v2959_v18, 0.0  ;;  %v2961_v23 = vpop.eup %2960 }
 0x43f   :  { %933 = vadd.xlane.f32.xlu1 %v932_v19  ;;  %v767_v24 = vsel %vm67_vm2, %v2961_v23, 0.0 }
 0x449   :  { %442 = vrot.lane.b32.xlu0 %v3166_v41, %s3047_s28 }
 0x450   :  { %772 = vrot.lane.b32.xlu1 %v3166_v41, %s3061_s19 }
 0x468   :  { %768 = vadd.xlane.f32.xlu0 %v767_v24  ;;  %v1104_v24 = vrot.slane %v3161_v38, %v1103_v22 }
 0x47e   :  { %937 = vrot.lane.b32.xlu0 %v3166_v41, %s3062_s20 }
 0x4c0   :  { %v439_v26 = vpop.xlane.xlu0 %438 }
 0x4c1   :  { %2962 = vrcp.f32 %v439_v26 }
 0x4c4   :  { %v443_v27 = vpop.permute.xlu0 %442  ;;  %v604_v28 = vpop.xlane.xlu1 %603 }
 0x4c5   :  { %2964 = vrcp.f32 %v604_v28  ;;  %2689 = vmatpush3.msra.mxu0 %v443_v27 }
 0x4c6   :  { %2698 = vmatprep.subr.mxu0 %v3050_v1 }
 0x4cb   :  { %v2963_v29 = vpop.eup %2962 }
 0x4cc   :  { %v441_v30 = vmul.f32 %v2963_v29, %v2955_v12  ;;  %v934_v31 = vpop.xlane.xlu1 %933 }
 0x4ce   :  { %2691 = vmatmul.mubr.msk.f32.vlgmr.msra.gmra.mrb[4].mxu0 %vm67_vm2, %v441_v30  ;;  %v2921_v30 = vld [vmem:[#allocation2 + $0xe8] sm:$0xff]  }
 0x4cf   :  { %v2965_v32 = vpop.eup %2964  ;;  %2699 = vmatpush3.msra.mxu0 %v608_v25  ;;  %2700 = vmatprep.mubr.msk.f32.mxu0 %vm3051_vm0, %v3050_v1 }
 0x4d0   :  { %v606_v33 = vmul.f32 %v2965_v32, %v2957_v16  ;;  %v773_v34 = vpop.permute.xlu1 %772  ;;  %2708 = vmatprep.subr.mxu0 %v3050_v1  ;;  %v2917_v16 = vld [vmem:[#allocation2 + $0xc8] sm:$0xff]   ;;  %v2923_v32 = vld [vmem:[#allocation2 + $0xf8] sm:$0xff]  }
 0x4d2   :  { %2701 = vmatmul.mubr.msk.f32.vlgmr.msra.gmra.mrb[6].mxu0 %vm67_vm2, %v606_v33  ;;  %v2924_v33 = vld [vmem:[#allocation2 + $0x100] sm:$0xff]  }
 0x4d3   :  { %2709 = vmatpush3.msra.mxu0 %v773_v34  ;;  %2710 = vmatprep.mubr.msk.f32.mxu0 %vm3051_vm0, %v3050_v1  ;;  %v2925_v34 = vld [vmem:[#allocation2 + $0x108] sm:$0xff]  }
 0x4d4   :  { %2718 = vmatprep.subr.mxu0 %v3050_v1 }
 0x4f5   :  { %v769_v39 = vpop.xlane.xlu0 %768 }
 0x4f6   :  { %2966 = vrcp.f32 %v769_v39  ;;  %v2926_v39 = vld [vmem:[#allocation2 + $0x110] sm:$0xff]  }
 0x4f7   :  { %2968 = vrcp.f32 %v934_v31  ;;  %v2922_v31 = vld [vmem:[#allocation2 + $0xf0] sm:$0xff]  }
 0x4f9   :  { %v938_v43 = vpop.permute.xlu0 %937 }
 0x500   :  { %v2967_v40 = vpop.eup %2966 }
 0x501   :  { %v771_v41 = vmul.f32 %v2967_v40, %v2961_v23  ;;  %v2969_v42 = vpop.eup %2968  ;;  %v1108_v23 = vsub.s32 3, %v3155_v36  ;;  %v2927_v40 = vld [vmem:[#allocation2 + $0x118] sm:$0xff]  }
 0x502   :  { %v936_v44 = vmul.f32 %v2969_v42, %v2959_v18  ;;  %v2920_v18 = vld [vmem:[#allocation2 + $0xe0] sm:$0xff]  }
 0x503   :  { %2711 = vmatmul.mubr.msk.f32.vlgmr.msra.gmra.mrb[8].mxu0 %vm67_vm2, %v771_v41  ;;  %v1109_v27 = vrot.slane %v3161_v38, %v1108_v23  ;;  %v1113_v41 = vsub.s32 4, %v3155_v36 }
 0x504   :  { %2719 = vmatpush3.msra.mxu0 %v938_v43  ;;  %2720 = vmatprep.mubr.msk.f32.mxu0 %vm3051_vm0, %v3050_v1 }
 0x505   :  { %2730 = vmatprep.subr.bf16.mxu0 %v3050_v1  ;;  %v1114_v42 = vrot.slane %v3161_v38, %v1113_v41 }
 0x507   :  { %2721 = vmatmul.mubr.msk.f32.vlgmr.msra.gmra.mrb[10].mxu0 %vm67_vm2, %v936_v44 }
 0x508   :  { %2746 = vmatprep.mubr.msk.f32.mxu0 %vm3051_vm0, %v3050_v1  ;;  %2731 = vmatpush3.bf16.msra.mxu0 %v2912_v5 }
 0x509   :  { %2732 = vmatprep.subr.bf16.mxu0 %v3050_v1 }
 0x50c   :  { %2733 = vmatpush3.bf16.msra.mxu0 %v2913_v6 }
 0x50d   :  { %2734 = vmatprep.subr.bf16.mxu0 %v3050_v1 }
 0x510   :  { %2735 = vmatpush3.bf16.msra.mxu0 %v2914_v7 }
 0x511   :  { %2736 = vmatprep.subr.bf16.mxu0 %v3050_v1 }
 0x514   :  { %2737 = vmatpush3.bf16.msra.mxu0 %v2915_v13 }
 0x515   :  { %2738 = vmatprep.subr.bf16.mxu0 %v3050_v1 }
 0x518   :  { %2739 = vmatpush3.bf16.msra.mxu0 %v2916_v14 }
 0x519   :  { %2740 = vmatprep.subr.bf16.mxu0 %v3050_v1 }
 0x51c   :  { %2741 = vmatpush3.bf16.msra.mxu0 %v2917_v16 }
 0x51d   :  { %2742 = vmatprep.subr.bf16.mxu0 %v3050_v1 }
 0x520   :  { %2743 = vmatpush3.bf16.msra.mxu0 %v2918_v15  ;;  %v1315_v15 = vsub.s32 6, %v3155_v36 }
 0x521   :  { %2744 = vmatprep.subr.bf16.mxu0 %v3050_v1 }
 0x524   :  { %2745 = vmatpush3.bf16.msra.mxu0 %v2919_v17  ;;  %v1320_v17 = vsub.s32 7, %v3155_v36 }
 0x525   :  { %2768 = vmatprep.subr.bf16.mxu0 %v3050_v1 }
 0x5a1   :  { %v514_v46 = vpop.f32.mrb[4].mxu0 }
 0x5a2   :  { %v2692_v47 = vpop.f32.mrb[5].mxu0 }
 0x5a5   :  { %v679_v48 = vpop.f32.mrb[6].mxu0 }
 0x5a6   :  { %1014 = vrot.lane.b32.xlu1 %v679_v48, %s3063_s21  ;;  %v2702_v49 = vpop.f32.mrb[7].mxu0 }
 0x5d6   :  { %v844_v52 = vpop.f32.mrb[8].mxu0 }
 0x5d7   :  { %1018 = vrot.lane.b32.xlu0 %v844_v52, %s3064_s22  ;;  %v2712_v53 = vpop.f32.mrb[9].mxu0 }
 0x5da   :  { %v1009_v54 = vpop.f32.mrb[10].mxu0 }
 0x5db   :  { %1022 = vrot.lane.b32.xlu1 %v1009_v54, %s3065_s23  ;;  %v2722_v55 = vpop.f32.mrb[11].mxu0 }
 0x618   :  { %v1015_v56 = vpop.permute.xlu1 %1014 }
 0x619   :  { %v1025_v58 = vsel %vm67_vm2, %v514_v46, %v1015_v56  ;;  %v1212_v56 = vsub.s32 5, %v3155_v36 }
 0x649   :  { %v1019_v57 = vpop.permute.xlu0 %1018 }
 0x64a   :  { %v1027_v59 = vsel %vm1026_vm5, %v1025_v58, %v1019_v57  ;;  %v1213_v57 = vrot.slane %v3161_v38, %v1212_v56 }
 0x64d   :  { %v1023_v60 = vpop.permute.xlu1 %1022 }
 0x64e   :  { %v1029_v61 = vsel %vm1028_vm6, %v1027_v59, %v1023_v60 }
 0x64f   :  { %2728 = vmatmul.mubr.msk.f32.vlgmr.msra.gmra.mrb[10].mxu1 %vm1046_vm7, %v1029_v61 }
 0x650   :  { %2765 = vmatprep.mubr.msk.f32.mxu1 %vm3051_vm0, %v3050_v1  ;;  %2750 = vmatpush3.bf16.msra.mxu1 %v2920_v18  ;;  %v1316_v18 = vrot.slane %v3161_v38, %v1315_v15 }
 0x651   :  { %2751 = vmatprep.subr.bf16.mxu1 %v3050_v1 }
 0x654   :  { %2752 = vmatpush3.bf16.msra.mxu1 %v2921_v30 }
 0x655   :  { %2753 = vmatprep.subr.bf16.mxu1 %v3050_v1 }
 0x658   :  { %2754 = vmatpush3.bf16.msra.mxu1 %v2922_v31 }
 0x659   :  { %2755 = vmatprep.subr.bf16.mxu1 %v3050_v1 }
 0x65c   :  { %2756 = vmatpush3.bf16.msra.mxu1 %v2923_v32 }
 0x65d   :  { %2757 = vmatprep.subr.bf16.mxu1 %v3050_v1 }
 0x660   :  { %2758 = vmatpush3.bf16.msra.mxu1 %v2924_v33 }
 0x661   :  { %2759 = vmatprep.subr.bf16.mxu1 %v3050_v1 }
 0x664   :  { %2760 = vmatpush3.bf16.msra.mxu1 %v2925_v34 }
 0x665   :  { %2761 = vmatprep.subr.bf16.mxu1 %v3050_v1 }
 0x668   :  { %2762 = vmatpush3.bf16.msra.mxu1 %v2926_v39 }
 0x669   :  { %2763 = vmatprep.subr.bf16.mxu1 %v3050_v1 }
 0x66c   :  { %2764 = vmatpush3.bf16.msra.mxu1 %v2927_v40 }
 0x66d   :  { %2787 = vmatprep.subr.mxu1 %v3050_v1 }
 0x722   :  { %v1084_v0 = vpop.f32.mrb[10].mxu1 }
 0x723   :  { %v1085_v2 = vadd.f32 %v1084_v0, %v1033_v63  ;;  %v2729_v3 = vpop.f32.mrb[11].mxu1  ;;  %v2928_v63 = vld [vmem:[#allocation2 + $0x120] sm:$0xff]   ;;  %v2929_v0 = vld [vmem:[#allocation2 + $0x128] sm:$0xff]  }
 0x725   :  { %v1088_v4 = vadd.f32 %v1085_v2, %v3150_v35  ;;  %v2930_v2 = vld [vmem:[#allocation2 + $0x130] sm:$0xff]  }
 0x727   :  { %1089 = vadd.xlane.f32.xlu0 %v1088_v4 }
 0x7b4   :  { %v1090_v8 = vpop.xlane.xlu0 %1089 }
 0x7b5   :  { %v1091_v9 = vmul.f32 0.03125, %v1090_v8  ;;  %v2931_v8 = vld [vmem:[#allocation2 + $0x138] sm:$0xff]  }
 0x7b7   :  { %v1092_v35 = vsub.f32 %v1088_v4, %v1091_v9  ;;  %v2932_v9 = vld [vmem:[#allocation2 + $0x140] sm:$0xff]  }
 0x7b9   :  { %v1093_v11 = vmul.f32 %v1092_v35, %v3265_v10  ;;  %v2933_v35 = vld [vmem:[#allocation2 + $0x148] sm:$0xff]  }
 0x7bb   :  { %v1094_v12 = vmul.f32 %v1093_v11, %v1093_v11 }
 0x7bd   :  { %1095 = vadd.xlane.f32.xlu1 %v1094_v12  ;;  %v2935_v12 = vld [vmem:[#allocation2 + $0x158] sm:$0xff]  }
 0x84a   :  { %v1096_v19 = vpop.xlane.xlu1 %1095 }
 0x84b   :  { %v1097_v20 = vmul.f32 0.03125, %v1096_v19 }
 0x84d   :  { %v1098_v21 = vadd.f32 1e-05, %v1097_v20 }
 0x84f   :  { %2970 = vrsqrt.f32 %v1098_v21  ;;  %v1321_v21 = vrot.slane %v3161_v38, %v1320_v17 }
 0x859   :  { %v2971_v25 = vpop.eup %2970 }
 0x85a   :  { %v1100_v26 = vmul.f32 %v2971_v25, %v1093_v11  ;;  %v2934_v11 = vld [vmem:[#allocation2 + $0x150] sm:$0xff]  }
 0x85c   :  { %v1105_v28 = vmul.f32 %v1104_v24, %v1100_v26  ;;  %v3326_v26 = vld [vmem:[%s3472_s4 + $0x8] sm:$0xff]  ;;  %s3066_s4 = smov [#allocation5]  }
 0x85d   :  { %s2439_s26 = sshll.u32 %s3066_s4, 4  ;;  %s2440_s26 = int_to_ptr.vmem [resolvable:$true] %s2439_s26 }
 0x85e   :  { %v1110_v29 = vadd.f32 %v1109_v27, %v1105_v28  ;;  %v1379_v27 = vrot.slane %v3326_v26, %v260_v37  ;;  %s3020_s27 = scalar_lea.vmem %s2440_s26, 128  ;;  %p3025_p9 = scmp.lt.s32.totalorder %s2440_s26, %s2440_s26 }
 0x85f   :  { %p3021_p8 = scmp.ne.s32.totalorder %s2440_s26, %s3020_s27  ;;  %p3026_p10 = scmp.lt.s32.totalorder %s3020_s27, %s3020_s27 }
 0x860   :  { %2747 = vmatmul.mubr.f32.vlgmr.msra.gmra.mrb[12].mxu0 %v1110_v29 }
 0x861   :  { %2784 = vmatprep.mubr.msk.f32.mxu0 %vm3051_vm0, %v3050_v1  ;;  %2769 = vmatpush3.bf16.msra.mxu0 %v2928_v63  ;;  %p3027_p11 = por %p3026_p10, %p3025_p9 }
 0x862   :  { %2770 = vmatprep.subr.bf16.mxu0 %v3050_v1 }
 0x863   :  { %p3028_p12 = pnand %p3027_p11, %p3021_p8 }
 0x865   :  { %2771 = vmatpush3.bf16.msra.mxu0 %v2929_v0 }
 0x866   :  { %2772 = vmatprep.subr.bf16.mxu0 %v3050_v1 }
 0x869   :  { %2773 = vmatpush3.bf16.msra.mxu0 %v2930_v2 }
 0x86a   :  { %2774 = vmatprep.subr.bf16.mxu0 %v3050_v1 }
 0x86d   :  { %2775 = vmatpush3.bf16.msra.mxu0 %v2931_v8 }
 0x86e   :  { %2776 = vmatprep.subr.bf16.mxu0 %v3050_v1 }
 0x871   :  { %2777 = vmatpush3.bf16.msra.mxu0 %v2932_v9 }
 0x872   :  { %2778 = vmatprep.subr.bf16.mxu0 %v3050_v1 }
 0x875   :  { %2779 = vmatpush3.bf16.msra.mxu0 %v2933_v35 }
 0x876   :  { %2780 = vmatprep.subr.bf16.mxu0 %v3050_v1 }
 0x879   :  { %2781 = vmatpush3.bf16.msra.mxu0 %v2934_v11 }
 0x87a   :  { %2782 = vmatprep.subr.bf16.mxu0 %v3050_v1 }
 0x87d   :  { %2783 = vmatpush3.bf16.msra.mxu0 %v2935_v12 }
 0x87e   :  { %2822 = vmatprep.subr.mxu0 %v3050_v1 }
 0x933   :  { %v1197_v43 = vpop.f32.mrb[12].mxu0 }
 0x934   :  { %v1198_v44 = vadd.f32 %v1197_v43, %v1114_v42  ;;  %v2748_v45 = vpop.f32.mrb[13].mxu0 }
 0x936   :  { %v1202_v46 = vmul.f32 0.044715, %v1198_v44  ;;  %v1201_v53 = vmul.f32 0.5, %v1198_v44 }
 0x938   :  { %v1203_v47 = vmul.f32 %v1202_v46, %v1198_v44 }
 0x93a   :  { %v1204_v48 = vmul.f32 %v1203_v47, %v1198_v44 }
 0x93c   :  { %v1205_v49 = vadd.f32 %v1204_v48, %v1198_v44 }
 0x93e   :  { %v1206_v51 = vmul.f32 0.7978846, %v1205_v49 }
 0x940   :  { %2972 = vtanh.f32 %v1206_v51 }
 0x94a   :  { %v2973_v52 = vpop.eup %2972 }
 0x94b   :  { %v1208_v54 = vadd.f32 1.0, %v2973_v52 }
 0x94d   :  { %v1209_v55 = vmul.f32 %v1208_v54, %v1201_v53 }
 0x94f   :  { %2766 = vmatmul.mubr.f32.vlgmr.msra.gmra.mrb[12].mxu1 %v1209_v55 }
 0x950   :  { %2789 = vmatprep.mubr.msk.f32.mxu1 %vm3051_vm0, %v3050_v1 }
 0xa22   :  { %v1296_v58 = vpop.f32.mrb[12].mxu1 }
 0xa23   :  { %v1297_v59 = vadd.f32 %v1296_v58, %v1213_v57  ;;  %v2767_v60 = vpop.f32.mrb[13].mxu1 }
 0xa25   :  { %v1300_v61 = vadd.f32 %v1297_v59, %v1110_v29 }
 0xa27   :  { %1301 = vadd.xlane.f32.xlu0 %v1300_v61 }
 0xab4   :  { %v1302_v3 = vpop.xlane.xlu0 %1301 }
 0xab5   :  { %v1303_v4 = vmul.f32 0.03125, %v1302_v3 }
 0xab7   :  { %v1304_v5 = vsub.f32 %v1300_v61, %v1303_v4 }
 0xab9   :  { %v1305_v6 = vmul.f32 %v1304_v5, %v3265_v10 }
 0xabb   :  { %v1306_v7 = vmul.f32 %v1305_v6, %v1305_v6 }
 0xabd   :  { %1307 = vadd.xlane.f32.xlu0 %v1306_v7 }
 0xb4a   :  { %v1308_v13 = vpop.xlane.xlu0 %1307 }
 0xb4b   :  { %v1309_v14 = vmul.f32 0.03125, %v1308_v13 }
 0xb4d   :  { %v1310_v16 = vadd.f32 1e-05, %v1309_v14 }
 0xb4f   :  { %2974 = vrsqrt.f32 %v1310_v16 }
 0xb59   :  { %v2975_v19 = vpop.eup %2974 }
 0xb5a   :  { %v1312_v20 = vmul.f32 %v2975_v19, %v1305_v6 }
 0xb5c   :  { %v1317_v24 = vmul.f32 %v1316_v18, %v1312_v20 }
 0xb5e   :  { %v3318_v25 = vadd.f32 %v1321_v21, %v1317_v24 }
 0xb60   :  { %2785 = vmatmul.mubr.f32.vlgmr.msra.gmra.mrb[14].mxu0 %v3318_v25 }
 0xb61   :  { %2824 = vmatprep.mubr.msk.f32.mxu0 %vm3051_vm0, %v3050_v1 }
 0xc33   :  { %v1462_v28 = vpop.f32.mrb[14].mxu0 }
 0xc34   :  { %v3331_v29 = vadd.f32 %v1462_v28, %v1379_v27  ;;  %v2786_v38 = vpop.f32.mrb[15].mxu0 }
 0xc36   :  { %1467 = vrot.lane.b32.xlu1 %v3331_v29, %s3054_s11 }
 0xc3a   :  { %1632 = vrot.lane.b32.xlu1 %v3331_v29, %s3056_s13 }
 0xc3e   :  { %1630 = vrot.lane.b32.xlu1 %v3331_v29, %s3053_s3 }
 0xca8   :  { %v1468_v30 = vpop.permute.xlu1 %1467 }
 0xca9   :  { %2788 = vmatpush3.xpose.msk.msra.mxu1 %vm67_vm2, %v1468_v30 }
 0xcaa   :  { %2792 = vmatprep.subr.mxu1 %v3050_v1 }
 0xcac   :  { %2790 = vmatmul.mubr.msk.f32.vlgmr.msra.gmra.mrb[14].mxu1 %vm67_vm2, %v3331_v29  ;;  %v1633_v47 = vpop.permute.xlu1 %1632 }
 0xcad   :  { %2794 = vmatprep.mubr.msk.f32.mxu1 %vm3051_vm0, %v3050_v1 }
 0xcb0   :  { %v1631_v49 = vpop.permute.xlu1 %1630 }
 0xd7f   :  { %v1539_v37 = vpop.f32.mrb[14].mxu1 }
 0xd80   :  { %v1540_v31 = vadd.f32 %v3206_v50, %v1539_v37  ;;  %v2791_v32 = vpop.f32.mrb[15].mxu1 }
 0xd82   :  { %v1543_v33 = vsel %vm67_vm2, %v1540_v31, -inf }
 0xd83   :  { %1544 = vmax.xlane.f32.xlu0 %v1543_v33 }
 0xe10   :  { %v1545_v34 = vpop.xlane.xlu0 %1544 }
 0xe11   :  { %v1546_v39 = vsub.f32 %v1540_v31, %v1545_v34 }
 0xe13   :  { %v1547_v40 = vmul.f32 1.442695, %v1546_v39 }
 0xe15   :  { %2976 = vpow2.f32 %v1547_v40 }
 0xe1f   :  { %v2977_v42 = vpop.eup %2976 }
 0xe20   :  { %v1549_v43 = vsel %vm67_vm2, %v2977_v42, 0.0 }
 0xe21   :  { %1550 = vadd.xlane.f32.xlu0 %v1549_v43 }
 0xe37   :  { %1554 = vrot.lane.b32.xlu0 %v3331_v29, %s3047_s28 }
 0xeae   :  { %v1551_v44 = vpop.xlane.xlu0 %1550 }
 0xeaf   :  { %2978 = vrcp.f32 %v1551_v44 }
 0xeb2   :  { %v1555_v45 = vpop.permute.xlu0 %1554 }
 0xeb3   :  { %2793 = vmatpush3.msra.mxu1 %v1555_v45 }
 0xeb4   :  { %2797 = vmatprep.subr.mxu1 %v3050_v1 }
 0xeb9   :  { %v2979_v46 = vpop.eup %2978 }
 0xeba   :  { %v1553_v48 = vmul.f32 %v2979_v46, %v2977_v42 }
 0xebc   :  { %2795 = vmatmul.mubr.msk.f32.vlgmr.msra.gmra.mrb[16].mxu1 %vm67_vm2, %v1553_v48  ;;  %v2937_v48 = vld [vmem:[#allocation2 + $0x168] sm:$0xff]  }
 0xebd   :  { %2798 = vmatpush3.xpose.msk.msra.mxu1 %vm67_vm2, %v1633_v47  ;;  %2799 = vmatprep.mubr.msk.f32.mxu1 %vm3051_vm0, %v3050_v1  ;;  %v2936_v47 = vld [vmem:[#allocation2 + $0x160] sm:$0xff]  }
 0xebe   :  { %2802 = vmatprep.subr.mxu1 %v3050_v1 }
 0xec0   :  { %2800 = vmatmul.mubr.msk.f32.vlgmr.msra.gmra.mrb[18].mxu1 %vm67_vm2, %v1631_v49 }
 0xec1   :  { %2804 = vmatprep.mubr.msk.f32.mxu1 %vm3051_vm0, %v3050_v1 }
 0xf8f   :  { %v3359_v51 = vpop.f32.mrb[16].mxu1 }
 0xf90   :  { %v2796_v52 = vpop.f32.mrb[17].mxu1 }
 0xf93   :  { %v1704_v53 = vpop.f32.mrb[18].mxu1 }
 0xf94   :  { %v1705_v54 = vadd.f32 %v3206_v50, %v1704_v53  ;;  %v2801_v55 = vpop.f32.mrb[19].mxu1 }
 0xf96   :  { %v1708_v57 = vsel %vm67_vm2, %v1705_v54, -inf }
 0xf97   :  { %1709 = vmax.xlane.f32.xlu1 %v1708_v57 }
 0xfa8   :  { %1719 = vrot.lane.b32.xlu1 %v3331_v29, %s3060_s2 }
 0xfac   :  { %1795 = vrot.lane.b32.xlu1 %v3331_v29, %s3055_s12 }
0x1024   :  { %v1710_v58 = vpop.xlane.xlu1 %1709 }
0x1025   :  { %v1711_v59 = vsub.f32 %v1705_v54, %v1710_v58 }
0x1027   :  { %v1712_v60 = vmul.f32 1.442695, %v1711_v59 }
0x1028   :  { %v1720_v61 = vpop.permute.xlu1 %1719 }
0x1029   :  { %2980 = vpow2.f32 %v1712_v60  ;;  %2803 = vmatpush3.msra.mxu1 %v1720_v61  ;;  %v2143_v60 = vrot.slane %v3326_v26, %v1032_v62 }
0x102a   :  { %2807 = vmatprep.subr.mxu1 %v3050_v1 }
0x102c   :  { %v1796_v6 = vpop.permute.xlu1 %1795 }
0x1033   :  { %v2981_v63 = vpop.eup %2980 }
0x1034   :  { %v1714_v0 = vsel %vm67_vm2, %v2981_v63, 0.0 }
0x1035   :  { %1715 = vadd.xlane.f32.xlu0 %v1714_v0 }
0x104b   :  { %1797 = vrot.lane.b32.xlu0 %v3331_v29, %s3058_s15 }
0x10c2   :  { %v1716_v2 = vpop.xlane.xlu0 %1715 }
0x10c3   :  { %2982 = vrcp.f32 %v1716_v2  ;;  %v2938_v2 = vld [vmem:[#allocation2 + $0x170] sm:$0xff]  }
0x10c6   :  { %v1798_v5 = vpop.permute.xlu0 %1797 }
0x10cd   :  { %v2983_v3 = vpop.eup %2982 }
0x10ce   :  { %v1718_v4 = vmul.f32 %v2983_v3, %v2981_v63  ;;  %v2939_v3 = vld [vmem:[#allocation2 + $0x178] sm:$0xff]  }
0x10d0   :  { %2805 = vmatmul.mubr.msk.f32.vlgmr.msra.gmra.mrb[20].mxu1 %vm67_vm2, %v1718_v4  ;;  %v2940_v4 = vld [vmem:[#allocation2 + $0x180] sm:$0xff]  }
0x10d1   :  { %2808 = vmatpush3.xpose.msk.msra.mxu1 %vm67_vm2, %v1798_v5  ;;  %2809 = vmatprep.mubr.msk.f32.mxu1 %vm3051_vm0, %v3050_v1 }
0x10d2   :  { %2812 = vmatprep.subr.mxu1 %v3050_v1 }
0x10d4   :  { %2810 = vmatmul.mubr.msk.f32.vlgmr.msra.gmra.mrb[22].mxu1 %vm67_vm2, %v1796_v6 }
0x10d5   :  { %2814 = vmatprep.mubr.msk.f32.mxu1 %vm3051_vm0, %v3050_v1 }
0x11a3   :  { %v1791_v7 = vpop.f32.mrb[20].mxu1 }
0x11a4   :  { %v2806_v8 = vpop.f32.mrb[21].mxu1 }
0x11a7   :  { %v1869_v9 = vpop.f32.mrb[22].mxu1 }
0x11a8   :  { %v1870_v35 = vadd.f32 %v3206_v50, %v1869_v9  ;;  %v2811_v11 = vpop.f32.mrb[23].mxu1  ;;  %v2942_v9 = vld [vmem:[#allocation2 + $0x190] sm:$0xff]  }
0x11a9   :  { %v2944_v11 = vld [vmem:[#allocation2 + $0x1a0] sm:$0xff]  }
0x11aa   :  { %v1873_v12 = vsel %vm67_vm2, %v1870_v35, -inf }
0x11ab   :  { %1874 = vmax.xlane.f32.xlu1 %v1873_v12  ;;  %v2945_v12 = vld [vmem:[#allocation2 + $0x1a8] sm:$0xff]  }
0x11bc   :  { %1962 = vrot.lane.b32.xlu1 %v3331_v29, %s3059_s16 }
0x11c0   :  { %1960 = vrot.lane.b32.xlu1 %v3331_v29, %s3057_s14 }
0x1238   :  { %v1875_v13 = vpop.xlane.xlu1 %1874 }
0x1239   :  { %v1876_v14 = vsub.f32 %v1870_v35, %v1875_v13  ;;  %v2943_v35 = vld [vmem:[#allocation2 + $0x198] sm:$0xff]   ;;  %v2946_v13 = vld [vmem:[#allocation2 + $0x1b0] sm:$0xff]  }
0x123b   :  { %v1877_v16 = vmul.f32 1.442695, %v1876_v14 }
0x123c   :  { %v1963_v27 = vpop.permute.xlu1 %1962 }
0x123d   :  { %2984 = vpow2.f32 %v1877_v16 }
0x1240   :  { %v1961_v38 = vpop.permute.xlu1 %1960 }
0x1247   :  { %v2985_v18 = vpop.eup %2984 }
0x1248   :  { %v1879_v19 = vsel %vm67_vm2, %v2985_v18, 0.0 }
0x1249   :  { %1880 = vadd.xlane.f32.xlu0 %v1879_v19  ;;  %v2213_v19 = vrot.slane %v3326_v26, %v1103_v22  ;;  %v2950_v22 = vld [vmem:[#allocation2 + $0x1d0] sm:$0xff]  }
0x125f   :  { %1884 = vrot.lane.b32.xlu0 %v3331_v29, %s3061_s19 }
0x12d6   :  { %v1881_v20 = vpop.xlane.xlu0 %1880 }
0x12d7   :  { %2986 = vrcp.f32 %v1881_v20 }
0x12da   :  { %v1885_v21 = vpop.permute.xlu0 %1884 }
0x12db   :  { %2813 = vmatpush3.msra.mxu1 %v1885_v21 }
0x12dc   :  { %2817 = vmatprep.subr.mxu1 %v3050_v1 }
0x12e1   :  { %v2987_v24 = vpop.eup %2986 }
0x12e2   :  { %v1883_v28 = vmul.f32 %v2987_v24, %v2985_v18  ;;  %v2218_v24 = vrot.slane %v3326_v26, %v1108_v23  ;;  %v2952_v23 = vld [vmem:[#allocation2 + $0x1e0] sm:$0xff]  }
0x12e4   :  { %2815 = vmatmul.mubr.msk.f32.vlgmr.msra.gmra.mrb[24].mxu1 %vm67_vm2, %v1883_v28 }
0x12e5   :  { %2818 = vmatpush3.xpose.msk.msra.mxu1 %vm67_vm2, %v1963_v27  ;;  %2819 = vmatprep.mubr.msk.f32.mxu1 %vm3051_vm0, %v3050_v1 }
0x12e6   :  { %2827 = vmatprep.subr.bf16.mxu1 %v3050_v1 }
0x12e8   :  { %2820 = vmatmul.mubr.msk.f32.vlgmr.msra.gmra.mrb[26].mxu1 %vm67_vm2, %v1961_v38  ;;  %v2947_v38 = vld [vmem:[#allocation2 + $0x1b8] sm:$0xff]  }
0x12e9   :  { %2831 = vmatprep.mubr.msk.f32.mxu1 %vm3051_vm0, %v3050_v1  ;;  %2828 = vmatpush3.bf16.msra.mxu1 %v2936_v47 }
0x12ea   :  { %2829 = vmatprep.subr.bf16.mxu1 %v3050_v1 }
0x12ed   :  { %2830 = vmatpush3.bf16.msra.mxu1 %v2937_v48 }
0x12ee   :  { %2853 = vmatprep.subr.bf16.mxu1 %v3050_v1 }
0x13b7   :  { %v1956_v30 = vpop.f32.mrb[24].mxu1 }
0x13b8   :  { %v2816_v37 = vpop.f32.mrb[25].mxu1 }
0x13b9   :  { %v2949_v37 = vld [vmem:[#allocation2 + $0x1c8] sm:$0xff]  }
0x13bb   :  { %v2034_v31 = vpop.f32.mrb[26].mxu1 }
0x13bc   :  { %v2035_v32 = vadd.f32 %v3206_v50, %v2034_v31  ;;  %v2821_v33 = vpop.f32.mrb[27].mxu1  ;;  %v2951_v31 = vld [vmem:[#allocation2 + $0x1d8] sm:$0xff]  }
0x13bd   :  { %v2223_v33 = vrot.slane %v3326_v26, %v1113_v41 }
0x13be   :  { %v2038_v34 = vsel %vm67_vm2, %v2035_v32, -inf }
0x13bf   :  { %2039 = vmax.xlane.f32.xlu0 %v2038_v34 }
0x13d5   :  { %2049 = vrot.lane.b32.xlu0 %v3331_v29, %s3062_s20 }
0x13d9   :  { %2130 = vrot.lane.b32.xlu0 %v1956_v30, %s3064_s22  ;;  %v2948_v30 = vld [vmem:[#allocation2 + $0x1c0] sm:$0xff]  }
0x144c   :  { %v2040_v39 = vpop.xlane.xlu0 %2039 }
0x144d   :  { %v2041_v40 = vsub.f32 %v2035_v32, %v2040_v39  ;;  %v2953_v32 = vld [vmem:[#allocation2 + $0x1e8] sm:$0xff]  }
0x144f   :  { %v2042_v42 = vmul.f32 1.442695, %v2041_v40 }
0x1450   :  { %v2050_v43 = vpop.permute.xlu0 %2049 }
0x1451   :  { %2988 = vpow2.f32 %v2042_v42  ;;  %2823 = vmatpush3.msra.mxu0 %v2050_v43 }
0x1452   :  { %2834 = vmatprep.subr.bf16.mxu0 %v3050_v1 }
0x1454   :  { %v2131_v55 = vpop.permute.xlu0 %2130 }
0x145b   :  { %v2989_v44 = vpop.eup %2988 }
0x145c   :  { %v2044_v50 = vsel %vm67_vm2, %v2989_v44, 0.0 }
0x145d   :  { %2045 = vadd.xlane.f32.xlu1 %v2044_v50 }
0x146e   :  { %2126 = vrot.lane.b32.xlu1 %v1791_v7, %s3063_s21 }
0x14ea   :  { %v2046_v45 = vpop.xlane.xlu1 %2045 }
0x14eb   :  { %2990 = vrcp.f32 %v2046_v45 }
0x14ee   :  { %v2127_v53 = vpop.permute.xlu1 %2126 }
0x14ef   :  { %v2137_v54 = vsel %vm67_vm2, %v3359_v51, %v2127_v53 }
0x14f0   :  { %v2138_v58 = vsel %vm1026_vm5, %v2137_v54, %v2131_v55 }
0x14f5   :  { %v2991_v46 = vpop.eup %2990 }
0x14f6   :  { %v2048_v29 = vmul.f32 %v2991_v46, %v2989_v44 }
0x14f8   :  { %2825 = vmatmul.mubr.msk.f32.vlgmr.msra.gmra.mrb[16].mxu0 %vm67_vm2, %v2048_v29 }
0x14f9   :  { %2850 = vmatprep.mubr.msk.f32.mxu0 %vm3051_vm0, %v3050_v1  ;;  %2835 = vmatpush3.bf16.msra.mxu0 %v2938_v2  ;;  %v2430_v2 = vrot.slane %v3326_v26, %v1320_v17 }
0x14fa   :  { %2836 = vmatprep.subr.bf16.mxu0 %v3050_v1 }
0x14fd   :  { %2837 = vmatpush3.bf16.msra.mxu0 %v2939_v3 }
0x14fe   :  { %2838 = vmatprep.subr.bf16.mxu0 %v3050_v1 }
0x1501   :  { %2839 = vmatpush3.bf16.msra.mxu0 %v2940_v4 }
0x1502   :  { %2840 = vmatprep.subr.bf16.mxu0 %v3050_v1 }
0x15cb   :  { %v2121_v49 = vpop.f32.mrb[16].mxu0 }
0x15cc   :  { %2134 = vrot.lane.b32.xlu1 %v2121_v49, %s3065_s23  ;;  %v2826_v52 = vpop.f32.mrb[17].mxu0 }
0x163e   :  { %v2135_v57 = vpop.permute.xlu1 %2134 }
0x163f   :  { %v2139_v59 = vsel %vm1028_vm6, %v2138_v58, %v2135_v57 }
0x1640   :  { %2832 = vmatmul.mubr.msk.f32.vlgmr.msra.gmra.mrb[28].mxu1 %vm1046_vm7, %v2139_v59 }
0x1641   :  { %2869 = vmatprep.mubr.msk.f32.mxu1 %vm3051_vm0, %v3050_v1  ;;  %2854 = vmatpush3.bf16.msra.mxu1 %v2946_v13 }
0x1642   :  { %2855 = vmatprep.subr.bf16.mxu1 %v3050_v1 }
0x1645   :  { %2856 = vmatpush3.bf16.msra.mxu1 %v2947_v38 }
0x1646   :  { %2857 = vmatprep.subr.bf16.mxu1 %v3050_v1 }
0x1649   :  { %2858 = vmatpush3.bf16.msra.mxu1 %v2948_v30 }
0x164a   :  { %2859 = vmatprep.subr.bf16.mxu1 %v3050_v1 }
0x164d   :  { %2860 = vmatpush3.bf16.msra.mxu1 %v2949_v37 }
0x164e   :  { %2861 = vmatprep.subr.bf16.mxu1 %v3050_v1 }
0x1651   :  { %2862 = vmatpush3.bf16.msra.mxu1 %v2950_v22 }
0x1652   :  { %2863 = vmatprep.subr.bf16.mxu1 %v3050_v1 }
0x1655   :  { %2864 = vmatpush3.bf16.msra.mxu1 %v2951_v31 }
0x1656   :  { %2865 = vmatprep.subr.bf16.mxu1 %v3050_v1 }
0x1659   :  { %2866 = vmatpush3.bf16.msra.mxu1 %v2952_v23 }
0x165a   :  { %2867 = vmatprep.subr.bf16.mxu1 %v3050_v1 }
0x165d   :  { %2868 = vmatpush3.bf16.msra.mxu1 %v2953_v32 }
0x1713   :  { %v2193_v61 = vpop.f32.mrb[28].mxu1 }
0x1714   :  { %v2194_v63 = vadd.f32 %v2193_v61, %v2143_v60  ;;  %v2833_v0 = vpop.f32.mrb[29].mxu1 }
0x1716   :  { %v2197_v51 = vadd.f32 %v2194_v63, %v3318_v25  ;;  %v2941_v25 = vld [vmem:[#allocation2 + $0x188] sm:$0xff]  }
0x1717   :  { %2841 = vmatpush3.bf16.msra.mxu0 %v2941_v25 }
0x1718   :  { %2198 = vadd.xlane.f32.xlu0 %v2197_v51  ;;  %2842 = vmatprep.subr.bf16.mxu0 %v3050_v1 }
0x171b   :  { %2843 = vmatpush3.bf16.msra.mxu0 %v2942_v9 }
0x171c   :  { %2844 = vmatprep.subr.bf16.mxu0 %v3050_v1 }
0x171f   :  { %2845 = vmatpush3.bf16.msra.mxu0 %v2943_v35 }
0x1720   :  { %2846 = vmatprep.subr.bf16.mxu0 %v3050_v1 }
0x1723   :  { %2847 = vmatpush3.bf16.msra.mxu0 %v2944_v11 }
0x1724   :  { %2848 = vmatprep.subr.bf16.mxu0 %v3050_v1  ;;  %v2322_v1 = vrot.slane %v3326_v26, %v1212_v56  ;;  %v2425_v56 = vrot.slane %v3326_v26, %v1315_v15 }
0x1727   :  { %2849 = vmatpush3.bf16.msra.mxu0 %v2945_v12 }
0x17a5   :  { %v2199_v5 = vpop.xlane.xlu0 %2198 }
0x17a6   :  { %v2200_v62 = vmul.f32 0.03125, %v2199_v5 }
0x17a8   :  { %v2201_v6 = vsub.f32 %v2197_v51, %v2200_v62 }
0x17aa   :  { %v2202_v7 = vmul.f32 %v2201_v6, %v3265_v10 }
0x17ac   :  { %v2203_v8 = vmul.f32 %v2202_v7, %v2202_v7 }
0x17ae   :  { %2204 = vadd.xlane.f32.xlu1 %v2203_v8 }
0x183b   :  { %v2205_v14 = vpop.xlane.xlu1 %2204 }
0x183c   :  { %v2206_v16 = vmul.f32 0.03125, %v2205_v14 }
0x183e   :  { %v2207_v18 = vadd.f32 1e-05, %v2206_v16 }
0x1840   :  { %2992 = vrsqrt.f32 %v2207_v18 }
0x184a   :  { %v2993_v20 = vpop.eup %2992 }
0x184b   :  { %v2209_v21 = vmul.f32 %v2993_v20, %v2202_v7 }
0x184d   :  { %v2214_v27 = vmul.f32 %v2213_v19, %v2209_v21 }
0x184f   :  { %v2219_v28 = vadd.f32 %v2218_v24, %v2214_v27 }
0x1851   :  { %2851 = vmatmul.mubr.f32.vlgmr.msra.gmra.mrb[18].mxu0 %v2219_v28 }
0x1924   :  { %v2306_v34 = vpop.f32.mrb[18].mxu0 }
0x1925   :  { %v2307_v39 = vadd.f32 %v2306_v34, %v2223_v33  ;;  %v2852_v40 = vpop.f32.mrb[19].mxu0 }
0x1927   :  { %v2311_v42 = vmul.f32 0.044715, %v2307_v39  ;;  %v2310_v29 = vmul.f32 0.5, %v2307_v39 }
0x1929   :  { %v2312_v43 = vmul.f32 %v2311_v42, %v2307_v39 }
0x192b   :  { %v2313_v44 = vmul.f32 %v2312_v43, %v2307_v39 }
0x192d   :  { %v2314_v50 = vadd.f32 %v2313_v44, %v2307_v39 }
0x192f   :  { %v2315_v45 = vmul.f32 0.7978846, %v2314_v50 }
0x1931   :  { %2994 = vtanh.f32 %v2315_v45 }
0x193b   :  { %v2995_v46 = vpop.eup %2994 }
0x193c   :  { %v2317_v47 = vadd.f32 1.0, %v2995_v46 }
0x193e   :  { %v2318_v48 = vmul.f32 %v2317_v47, %v2310_v29 }
0x1940   :  { %2870 = vmatmul.mubr.f32.vlgmr.msra.gmra.mrb[30].mxu1 %v2318_v48 }
0x1a13   :  { %v2405_v49 = vpop.f32.mrb[30].mxu1 }
0x1a14   :  { %v2406_v41 = vadd.f32 %v2405_v49, %v2322_v1  ;;  %v2871_v52 = vpop.f32.mrb[31].mxu1 }
0x1a16   :  { %v2409_v53 = vadd.f32 %v2406_v41, %v2219_v28 }
0x1a18   :  { %2410 = vadd.xlane.f32.xlu0 %v2409_v53 }
0x1aa5   :  { %v2411_v54 = vpop.xlane.xlu0 %2410 }
0x1aa6   :  { %v2412_v55 = vmul.f32 0.03125, %v2411_v54 }
0x1aa8   :  { %v2413_v57 = vsub.f32 %v2409_v53, %v2412_v55 }
0x1aaa   :  { %v2414_v58 = vmul.f32 %v2413_v57, %v3265_v10 }
0x1aac   :  { %v2415_v59 = vmul.f32 %v2414_v58, %v2414_v58 }
0x1aae   :  { %2416 = vadd.xlane.f32.xlu0 %v2415_v59 }
0x1b3b   :  { %v2417_v60 = vpop.xlane.xlu0 %2416 }
0x1b3c   :  { %v2418_v61 = vmul.f32 0.03125, %v2417_v60 }
0x1b3e   :  { %v2419_v63 = vadd.f32 1e-05, %v2418_v61 }
0x1b40   :  { %2996 = vrsqrt.f32 %v2419_v63 }
0x1b4a   :  { %v2997_v0 = vpop.eup %2996 }
0x1b4b   :  { %v2421_v51 = vmul.f32 %v2997_v0, %v2414_v58 }
0x1b4d   :  { %v2426_v3 = vmul.f32 %v2425_v56, %v2421_v51 }
0x1b4f   :  { %v2431_v10 = vadd.f32 %v2430_v2, %v2426_v3 }
0x1b51   :  { %2432 = vst [vmem:[#allocation5] sm:$0xff] %v2431_v10 }
0x1b52   :  { %3031 = shalt.err (!%p3028_p12)
}
0x1b53   :  { %s3032_s30 = scalar_lea.hbm %s3473_s5, 128 }
0x1b54   :  { %p3033_p13 = scmp.ne.s32.totalorder %s3473_s5, %s3032_s30  ;;  %p3036_p0 = scmp.lt.u32.totalorder %s3032_s30, %s3473_s5 }
0x1b56   :  { %p3038_p1 = pnand %p3036_p0, %p3033_p13 }
0x1b58   :  { %3041 = shalt.err (!%p3038_p1)
}
0x1b59   :  { %2442 = dma.vmem_to_hbm [thread:$0]  %s2440_s26, 128, %s3473_s5, [#allocation4]  }
0x1b5a   :  { %3044 = dma.done.wait [#allocation4], 128  }
0x1b5b   :  { %3045 = vsyncadd [#allocation4], 4294967168 }
0x1b5c   :  { %2446 = vsyncpa [#allocation3], 1 }
0x1b5d   :  { %2447 = vsyncpa [#allocation4], 1 }

</bundles_post_ra>
